<compile_context>
chip_gen: v7x
topology: tpu7x:2x2x1
jax: 0.10.0
libtpu: 0.0.40
codegen_flags: <defaults>
</compile_context>

<pallas_src>
import functools

import jax
import jax.numpy as jnp
import numpy as np
from jax import lax
from jax.experimental import pallas as pl
from jax.experimental.pallas import tpu as pltpu


def _round_up(v, m):
    return ((v + m - 1) // m) * m


# ---------------------------------------------------------------------------
# Fused kernel: per grid step (batch block b, time chunk c)
#   Stage A (parallel): gi[i] = x[i] @ W_ih^T + folded_bias  -> VMEM scratch (no HBM trip)
#   Stage B (serial)  : h = GRU_cell(gi[i], h)               -> out[i], carried h in f32
# ---------------------------------------------------------------------------
def _gru_fused_kernel(x_ref, h0_ref, wih_ref, whh_ref, bias_ref, bhn_ref,
                      out_ref, hn_ref, gi_scratch, h_scratch, *,
                      chunk, seq_len, hp, b_blk, masked, unroll):
    c = pl.program_id(1)

    @pl.when(c == 0)
    def _():
        h_scratch[...] = h0_ref[...].astype(jnp.float32)

    wih = wih_ref[...]                      # (Dp, 3Hp)  resident, param dtype
    whh = whh_ref[...]                      # (Hp, 3Hp)  resident, param dtype
    # Hoisted broadcasts (JAX does not CSE broadcast_in_dim inside the loops).
    bias_b = jnp.broadcast_to(bias_ref[...], (b_blk, 3 * hp))   # b_ih + b_hh[r,z], f32
    bhn_b = jnp.broadcast_to(bhn_ref[...], (b_blk, hp))         # b_hn, f32

    # ---- Stage A: input projection for the whole chunk (independent slabs, MXU-pipelined).
    def proj_step(i, carry):
        gi_scratch[i] = (
            jnp.dot(x_ref[i], wih, preferred_element_type=jnp.float32) + bias_b)
        return carry

    lax.fori_loop(0, chunk, proj_step, 0, unroll=unroll)

    # ---- Stage B: serial recurrence over the chunk's timesteps.
    def step(i, carry):
        h_prev = h_scratch[...]                                   # (B_blk, Hp) f32 carry
        gi = gi_scratch[i]                                        # (B_blk, 3Hp) f32
        gh = jnp.dot(h_prev.astype(whh.dtype), whh,
                     preferred_element_type=jnp.float32)          # (B_blk, 3Hp)
        r = jax.nn.sigmoid(gi[:, 0:hp] + gh[:, 0:hp])
        z = jax.nn.sigmoid(gi[:, hp:2 * hp] + gh[:, hp:2 * hp])
        n = jnp.tanh(gi[:, 2 * hp:] + r * (gh[:, 2 * hp:] + bhn_b))
        h_new = (1.0 - z) * n + z * h_prev
        if masked:  # static flag: only when T was padded up to a chunk multiple
            t = c * chunk + i
            h_new = jnp.where(t < seq_len, h_new, h_prev)
        h_scratch[...] = h_new
        out_ref[i] = h_new.astype(out_ref.dtype)                  # full-vreg, lane-dense store
        return carry

    lax.fori_loop(0, chunk, step, 0, unroll=unroll)

    # Final hidden state written exactly once, on the last time chunk of this batch block.
    @pl.when(c == pl.num_programs(1) - 1)
    def _():
        hn_ref[...] = h_scratch[...].astype(hn_ref.dtype)


def gru_forward_pallas(x, hx, wih_t, whh_t, bias_fold, bhn, *,
                       hidden_size, chunk_size=128,
                       batch_core_split=1, single_buffer_invariants=False):
    """PyTorch-semantics single-layer GRU forward.

    x: (T, B, D); hx: (1, B, H).
    wih_t: (Dp, 3Hp), whh_t: (Hp, 3Hp), bias_fold: (1, 3Hp), bhn: (1, Hp) -- padded/pre-prepped.
    Returns (output (T, B, H), h_n (1, B, H)).
    """
    T, B, D = x.shape
    H = hidden_size
    Dp, Gp = wih_t.shape
    Hp = whh_t.shape[0]
    pdt = wih_t.dtype
    out_dtype = x.dtype

    # ---- one-shot layout padding (production shapes should already be aligned)
    Bp = _round_up(B, 8)
    chunk = max(1, min(chunk_size, T))
    n_chunks = -(-T // chunk)
    Tp = n_chunks * chunk

    xp = jnp.pad(x, ((0, Tp - T), (0, Bp - B), (0, Dp - D))).astype(pdt)
    h0 = jnp.pad(hx[0], ((0, Bp - B), (0, Hp - H))).astype(jnp.float32)

    # Optional batch split across TensorCores (v7x): keep each block sublane-aligned (mult of 8).
    nb = batch_core_split if (batch_core_split >= 1 and Bp % (8 * batch_core_split) == 0) else 1
    b_blk = Bp // nb

    masked = (Tp != T)
    unroll = True if chunk <= 32 else 8      # partial unroll for LLO scheduling visibility

    def inv_spec(shape):
        # Grid-invariant operands (weights / biases): constant index_map, optionally
        # single-buffered to halve their resident footprint (v7x 64-MiB VMEM).
        if single_buffer_invariants:
            return pl.BlockSpec(shape, lambda b, c, n=len(shape): (0,) * n,
                                pipeline_mode=pl.Buffered(1))
        return pl.BlockSpec(shape, lambda b, c, n=len(shape): (0,) * n)

    kernel = functools.partial(
        _gru_fused_kernel, chunk=chunk, seq_len=T, hp=Hp,
        b_blk=b_blk, masked=masked, unroll=unroll)

    out_full, h_last = pl.pallas_call(
        kernel,
        out_shape=(
            jax.ShapeDtypeStruct((Tp, Bp, Hp), out_dtype),
            jax.ShapeDtypeStruct((Bp, Hp), out_dtype),
        ),
        grid_spec=pltpu.PrefetchScalarGridSpec(
            num_scalar_prefetch=0,
            grid=(nb, n_chunks),
            in_specs=[
                pl.BlockSpec((chunk, b_blk, Dp), lambda b, c: (c, b, 0)),   # x chunk
                pl.BlockSpec((b_blk, Hp), lambda b, c: (b, 0)),             # h0 (per batch blk)
                inv_spec((Dp, Gp)),                                         # W_ih^T (resident)
                inv_spec((Hp, Gp)),                                         # W_hh^T (resident)
                inv_spec((1, Gp)),                                          # folded bias
                inv_spec((1, Hp)),                                          # b_hn
            ],
            out_specs=[
                pl.BlockSpec((chunk, b_blk, Hp), lambda b, c: (c, b, 0)),   # per-chunk outputs
                pl.BlockSpec((b_blk, Hp), lambda b, c: (b, 0)),             # final hidden state
            ],
            scratch_shapes=[
                pltpu.VMEM((chunk, b_blk, Gp), jnp.float32),   # gi for current chunk (VMEM only)
                pltpu.VMEM((b_blk, Hp), jnp.float32),          # carried hidden state (f32)
            ],
        ),
        compiler_params=pltpu.CompilerParams(
            dimension_semantics=("parallel", "arbitrary"),     # batch parallel, time serial
            vmem_limit_bytes=48 * 1024 * 1024,                 # above 16/32-MiB scoped defaults,
        ),                                                     # below v7x's 64-MiB physical
    )(xp, h0, wih_t, whh_t, bias_fold, bhn)

    out = out_full[:T, :B, :H]
    h_n = h_last[None, :B, :H]
    return out, h_n


def gru_forward_ref(x, hx, w_ih, w_hh, b_ih, b_hh):
    """Pure-JAX reference with PyTorch GRU semantics."""
    H = w_hh.shape[1]

    def step(h, x_t):
        gi = x_t @ w_ih.T + b_ih
        gh = h @ w_hh.T + b_hh
        i_r, i_z, i_n = gi[:, :H], gi[:, H:2 * H], gi[:, 2 * H:]
        h_r, h_z, h_n = gh[:, :H], gh[:, H:2 * H], gh[:, 2 * H:]
        r = jax.nn.sigmoid(i_r + h_r)
        z = jax.nn.sigmoid(i_z + h_z)
        n = jnp.tanh(i_n + r * h_n)
        h_new = (1.0 - z) * n + z * h
        return h_new, h_new

    h_last, outs = jax.lax.scan(step, hx[0], x)
    return outs, h_last[None]


class ModuleWrapperIgnores2ndArg_gru:
    """JAX/Pallas analogue of the PyTorch wrapper: ignores the dummy arg, runs the GRU."""

    def __init__(self, gru_params, param_dtype=jnp.float32, chunk_size=128,
                 batch_core_split=1, single_buffer_invariants=False):
        # batch_core_split=2 + single_buffer_invariants=True are the v7x knobs
        # (2 TensorCores, 64 MiB VMEM); defaults target single-TC v5e/v6e.
        w_ih, w_hh, b_ih, b_hh = (jnp.asarray(p, jnp.float32) for p in gru_params)
        H = w_hh.shape[1]
        D = w_ih.shape[1]
        Hp = _round_up(H, 128)   # lane-aligned hidden size (gate slices on 128 boundaries)
        Dp = _round_up(D, 128)

        def pad_gate_cols(m, h, hp):
            # (rows, 3h) -> (rows, 3hp): zero-pad each gate slice independently so the
            # r/z/n gates start at lane-tile-aligned offsets 0, hp, 2hp.
            parts = [jnp.pad(m[:, g * h:(g + 1) * h], ((0, 0), (0, hp - h))) for g in range(3)]
            return jnp.concatenate(parts, axis=1)

        # One-time weight prep (hoisted out of the forward call):
        #  - transpose so kernels do (rows, Dp) @ (Dp, 3Hp) / (B, Hp) @ (Hp, 3Hp)
        #  - pad to lane/sublane-aligned sizes with zeros (padding provably does not
        #    contaminate the real H columns)
        #  - fold b_ih and the r/z parts of b_hh into the hoisted input projection
        #  - keep only b_hn for the per-step recurrent term (it sits inside r * (...))
        wih_t = jnp.pad(pad_gate_cols(w_ih.T, H, Hp), ((0, Dp - D), (0, 0)))   # (Dp, 3Hp)
        whh_t = jnp.pad(pad_gate_cols(w_hh.T, H, Hp), ((0, Hp - H), (0, 0)))   # (Hp, 3Hp)
        bias_fold = b_ih + jnp.concatenate([b_hh[:2 * H], jnp.zeros((H,), b_hh.dtype)])
        bias_fold = pad_gate_cols(bias_fold.reshape(1, 3 * H), H, Hp)          # (1, 3Hp)
        bhn = jnp.pad(b_hh[2 * H:].reshape(1, H), ((0, 0), (0, Hp - H)))       # (1, Hp)

        self.wih_t = wih_t.astype(param_dtype)            # bf16 recommended for production
        self.whh_t = whh_t.astype(param_dtype)
        self.bias_fold = bias_fold.astype(jnp.float32)    # biases stay f32 (added post-matmul)
        self.bhn = bhn.astype(jnp.float32)
        self.hidden_size = H
        self.chunk_size = chunk_size
        self.batch_core_split = batch_core_split
        self.single_buffer_invariants = single_buffer_invariants

    def __call__(self, x, hx, dummy_arg=None):
        assert dummy_arg is not None, 'dummy_arg is required but was None'
        return gru_forward_pallas(
            x, hx, self.wih_t, self.whh_t, self.bias_fold, self.bhn,
            hidden_size=self.hidden_size, chunk_size=self.chunk_size,
            batch_core_split=self.batch_core_split,
            single_buffer_invariants=self.single_buffer_invariants)


if __name__ == "__main__":
    # Small shapes consistent with an nn.GRU(input_size=32, hidden_size=32).
    T, B, D, H = 8, 2, 32, 32

    key = jax.random.PRNGKey(0)
    k_x, k_h, k_wi, k_wh, k_bi, k_bh = jax.random.split(key, 6)

    # PyTorch-style uniform(-1/sqrt(H), 1/sqrt(H)) init, deterministic in-script.
    bound = 1.0 / np.sqrt(H)
    w_ih = jax.random.uniform(k_wi, (3 * H, D), jnp.float32, -bound, bound)
    w_hh = jax.random.uniform(k_wh, (3 * H, H), jnp.float32, -bound, bound)
    b_ih = jax.random.uniform(k_bi, (3 * H,), jnp.float32, -bound, bound)
    b_hh = jax.random.uniform(k_bh, (3 * H,), jnp.float32, -bound, bound)

    x = jax.random.normal(k_x, (T, B, D), jnp.float32)
    hx = jax.random.normal(k_h, (1, B, H), jnp.float32)
    dummy = jnp.ones((1,), jnp.float32)  # required-but-ignored arg, mirrors the wrapper API

    out_ref, h_n_ref = gru_forward_ref(x, hx, w_ih, w_hh, b_ih, b_hh)

    # f32 path: tight correctness check against the pure-JAX reference (PyTorch semantics).
    wrapper = ModuleWrapperIgnores2ndArg_gru((w_ih, w_hh, b_ih, b_hh))
    out, h_n = wrapper(x, hx, dummy)
    out = jax.block_until_ready(out)
    h_n = jax.block_until_ready(h_n)
    np.testing.assert_allclose(np.asarray(out), np.asarray(out_ref), rtol=1e-5, atol=1e-5)
    np.testing.assert_allclose(np.asarray(h_n), np.asarray(h_n_ref), rtol=1e-5, atol=1e-5)

    # bf16-weight path (native MXU dtype): loose tolerance vs. the f32 reference.
    wrapper_bf16 = ModuleWrapperIgnores2ndArg_gru((w_ih, w_hh, b_ih, b_hh),
                                                  param_dtype=jnp.bfloat16)
    out_bf, h_n_bf = wrapper_bf16(x, hx, dummy)
    out_bf = jax.block_until_ready(out_bf)
    h_n_bf = jax.block_until_ready(h_n_bf)
    np.testing.assert_allclose(np.asarray(out_bf), np.asarray(out_ref), rtol=1e-1, atol=1e-1)
    np.testing.assert_allclose(np.asarray(h_n_bf), np.asarray(h_n_ref), rtol=1e-1, atol=1e-1)

    print("KERNEL_OK")
</pallas_src>

<mosaic_0001>
module attributes {stable_mosaic.version = 11 : i64} {
  func.func @_gru_fused_kernel(%arg0: i32, %arg1: i32, %arg2: memref<8x8x128xf32, #tpu.memory_space<vmem>>, %arg3: memref<8x128xf32, #tpu.memory_space<vmem>>, %arg4: memref<128x384xf32, #tpu.memory_space<vmem>>, %arg5: memref<128x384xf32, #tpu.memory_space<vmem>>, %arg6: memref<1x384xf32, #tpu.memory_space<vmem>>, %arg7: memref<1x128xf32, #tpu.memory_space<vmem>>, %arg8: memref<8x8x128xf32, #tpu.memory_space<vmem>>, %arg9: memref<8x128xf32, #tpu.memory_space<vmem>>, %arg10: memref<8x8x384xf32, #tpu.memory_space<vmem>>, %arg11: memref<8x128xf32, #tpu.memory_space<vmem>>) attributes {dimension_semantics = [#tpu.dimension_semantics<parallel>, #tpu.dimension_semantics<arbitrary>], iteration_bounds = array<i64: 1, 1>, scalar_prefetch = 0 : i64, scratch_operands = 2 : i64, tpu.core_type = #tpu.core_type<tc>, window_params = [{transform_indices = @transform_0, window_bounds = array<i64: 8, 8, 128>}, {transform_indices = @transform_1, window_bounds = array<i64: 8, 128>}, {pipeline_mode = #tpu.pipeline_mode<synchronous>, transform_indices = @transform_2, window_bounds = array<i64: 128, 384>}, {pipeline_mode = #tpu.pipeline_mode<synchronous>, transform_indices = @transform_3, window_bounds = array<i64: 128, 384>}, {pipeline_mode = #tpu.pipeline_mode<synchronous>, transform_indices = @transform_4, window_bounds = array<i64: 1, 384>}, {pipeline_mode = #tpu.pipeline_mode<synchronous>, transform_indices = @transform_5, window_bounds = array<i64: 1, 128>}, {transform_indices = @transform_6, window_bounds = array<i64: 8, 8, 128>}, {transform_indices = @transform_7, window_bounds = array<i64: 8, 128>}]} {
    %c0_i32 = arith.constant 0 : i32
    %0 = arith.cmpi eq, %arg1, %c0_i32 : i32
    %1 = arith.extui %0 : i1 to i32
    %c0_i32_0 = arith.constant 0 : i32
    %2 = arith.cmpi ne, %1, %c0_i32_0 : i32
    scf.if %2 {
      %c0_155 = arith.constant 0 : index
      %c0_156 = arith.constant 0 : index
      %382 = vector.load %arg3[%c0_155, %c0_156] : memref<8x128xf32, #tpu.memory_space<vmem>>, vector<8x128xf32>
      %c0_157 = arith.constant 0 : index
      %c0_158 = arith.constant 0 : index
      %383 = vector.load %arg11[%c0_157, %c0_158] : memref<8x128xf32, #tpu.memory_space<vmem>>, vector<8x128xf32>
      tpu.vector_store %arg11[%c0_157, %c0_158], %382 {strides = array<i32>} : memref<8x128xf32, #tpu.memory_space<vmem>>, vector<8x128xf32>,
    } else {
    }
    %c0 = arith.constant 0 : index
    %c0_1 = arith.constant 0 : index
    %3 = vector.load %arg4[%c0, %c0_1] : memref<128x384xf32, #tpu.memory_space<vmem>>, vector<128x384xf32>
    %c0_2 = arith.constant 0 : index
    %c0_3 = arith.constant 0 : index
    %4 = vector.load %arg5[%c0_2, %c0_3] : memref<128x384xf32, #tpu.memory_space<vmem>>, vector<128x384xf32>
    %c0_4 = arith.constant 0 : index
    %c0_5 = arith.constant 0 : index
    %5 = vector.load %arg6[%c0_4, %c0_5] : memref<1x384xf32, #tpu.memory_space<vmem>>, vector<1x384xf32>
    %6 = vector.shape_cast %5 : vector<1x384xf32> to vector<1x384xf32>
    %7 = vector.broadcast %6 : vector<1x384xf32> to vector<8x384xf32>
    %c0_6 = arith.constant 0 : index
    %c0_7 = arith.constant 0 : index
    %8 = vector.load %arg7[%c0_6, %c0_7] : memref<1x128xf32, #tpu.memory_space<vmem>>, vector<1x128xf32>
    %9 = vector.shape_cast %8 : vector<1x128xf32> to vector<1x128xf32>
    %10 = vector.broadcast %9 : vector<1x128xf32> to vector<8x128xf32>
    %c0_i32_8 = arith.constant 0 : i32
    %11 = arith.index_cast %c0_i32_8 : i32 to index
    %c0_9 = arith.constant 0 : index
    %c0_10 = arith.constant 0 : index
    %12 = vector.load %arg2[%11, %c0_9, %c0_10] : memref<8x8x128xf32, #tpu.memory_space<vmem>>, vector<1x8x128xf32>
    %13 = vector.shape_cast %12 : vector<1x8x128xf32> to vector<8x128xf32>
    %cst = arith.constant dense<0.000000e+00> : vector<8x384xf32>
    %14 = tpu.matmul %13, %3, %cst {dimension_numbers = #tpu.dot_dimension_numbers<[1], [0], [0], [1], [0, 0, 1, 1], [], []>} : vector<8x128xf32>, vector<128x384xf32>, vector<8x384xf32> -> vector<8x384xf32>
    %15 = arith.addf %14, %7 : vector<8x384xf32>
    %16 = arith.index_cast %c0_i32_8 : i32 to index
    %c0_11 = arith.constant 0 : index
    %c0_12 = arith.constant 0 : index
    %17 = vector.load %arg10[%16, %c0_11, %c0_12] : memref<8x8x384xf32, #tpu.memory_space<vmem>>, vector<1x8x384xf32>
    %18 = vector.shape_cast %17 : vector<1x8x384xf32> to vector<8x384xf32>
    %19 = vector.shape_cast %15 : vector<8x384xf32> to vector<1x8x384xf32>
    tpu.vector_store %arg10[%16, %c0_11, %c0_12], %19 {strides = array<i32>} : memref<8x8x384xf32, #tpu.memory_space<vmem>>, vector<1x8x384xf32>,
    %c1_i32 = arith.constant 1 : i32
    %20 = arith.index_cast %c1_i32 : i32 to index
    %c0_13 = arith.constant 0 : index
    %c0_14 = arith.constant 0 : index
    %21 = vector.load %arg2[%20, %c0_13, %c0_14] : memref<8x8x128xf32, #tpu.memory_space<vmem>>, vector<1x8x128xf32>
    %22 = vector.shape_cast %21 : vector<1x8x128xf32> to vector<8x128xf32>
    %cst_15 = arith.constant dense<0.000000e+00> : vector<8x384xf32>
    %23 = tpu.matmul %22, %3, %cst_15 {dimension_numbers = #tpu.dot_dimension_numbers<[1], [0], [0], [1], [0, 0, 1, 1], [], []>} : vector<8x128xf32>, vector<128x384xf32>, vector<8x384xf32> -> vector<8x384xf32>
    %24 = arith.addf %23, %7 : vector<8x384xf32>
    %25 = arith.index_cast %c1_i32 : i32 to index
    %c0_16 = arith.constant 0 : index
    %c0_17 = arith.constant 0 : index
    %26 = vector.load %arg10[%25, %c0_16, %c0_17] : memref<8x8x384xf32, #tpu.memory_space<vmem>>, vector<1x8x384xf32>
    %27 = vector.shape_cast %26 : vector<1x8x384xf32> to vector<8x384xf32>
    %28 = vector.shape_cast %24 : vector<8x384xf32> to vector<1x8x384xf32>
    tpu.vector_store %arg10[%25, %c0_16, %c0_17], %28 {strides = array<i32>} : memref<8x8x384xf32, #tpu.memory_space<vmem>>, vector<1x8x384xf32>,
    %c2_i32 = arith.constant 2 : i32
    %29 = arith.index_cast %c2_i32 : i32 to index
    %c0_18 = arith.constant 0 : index
    %c0_19 = arith.constant 0 : index
    %30 = vector.load %arg2[%29, %c0_18, %c0_19] : memref<8x8x128xf32, #tpu.memory_space<vmem>>, vector<1x8x128xf32>
    %31 = vector.shape_cast %30 : vector<1x8x128xf32> to vector<8x128xf32>
    %cst_20 = arith.constant dense<0.000000e+00> : vector<8x384xf32>
    %32 = tpu.matmul %31, %3, %cst_20 {dimension_numbers = #tpu.dot_dimension_numbers<[1], [0], [0], [1], [0, 0, 1, 1], [], []>} : vector<8x128xf32>, vector<128x384xf32>, vector<8x384xf32> -> vector<8x384xf32>
    %33 = arith.addf %32, %7 : vector<8x384xf32>
    %34 = arith.index_cast %c2_i32 : i32 to index
    %c0_21 = arith.constant 0 : index
    %c0_22 = arith.constant 0 : index
    %35 = vector.load %arg10[%34, %c0_21, %c0_22] : memref<8x8x384xf32, #tpu.memory_space<vmem>>, vector<1x8x384xf32>
    %36 = vector.shape_cast %35 : vector<1x8x384xf32> to vector<8x384xf32>
    %37 = vector.shape_cast %33 : vector<8x384xf32> to vector<1x8x384xf32>
    tpu.vector_store %arg10[%34, %c0_21, %c0_22], %37 {strides = array<i32>} : memref<8x8x384xf32, #tpu.memory_space<vmem>>, vector<1x8x384xf32>,
    %c3_i32 = arith.constant 3 : i32
    %38 = arith.index_cast %c3_i32 : i32 to index
    %c0_23 = arith.constant 0 : index
    %c0_24 = arith.constant 0 : index
    %39 = vector.load %arg2[%38, %c0_23, %c0_24] : memref<8x8x128xf32, #tpu.memory_space<vmem>>, vector<1x8x128xf32>
    %40 = vector.shape_cast %39 : vector<1x8x128xf32> to vector<8x128xf32>
    %cst_25 = arith.constant dense<0.000000e+00> : vector<8x384xf32>
    %41 = tpu.matmul %40, %3, %cst_25 {dimension_numbers = #tpu.dot_dimension_numbers<[1], [0], [0], [1], [0, 0, 1, 1], [], []>} : vector<8x128xf32>, vector<128x384xf32>, vector<8x384xf32> -> vector<8x384xf32>
    %42 = arith.addf %41, %7 : vector<8x384xf32>
    %43 = arith.index_cast %c3_i32 : i32 to index
    %c0_26 = arith.constant 0 : index
    %c0_27 = arith.constant 0 : index
    %44 = vector.load %arg10[%43, %c0_26, %c0_27] : memref<8x8x384xf32, #tpu.memory_space<vmem>>, vector<1x8x384xf32>
    %45 = vector.shape_cast %44 : vector<1x8x384xf32> to vector<8x384xf32>
    %46 = vector.shape_cast %42 : vector<8x384xf32> to vector<1x8x384xf32>
    tpu.vector_store %arg10[%43, %c0_26, %c0_27], %46 {strides = array<i32>} : memref<8x8x384xf32, #tpu.memory_space<vmem>>, vector<1x8x384xf32>,
    %c4_i32 = arith.constant 4 : i32
    %47 = arith.index_cast %c4_i32 : i32 to index
    %c0_28 = arith.constant 0 : index
    %c0_29 = arith.constant 0 : index
    %48 = vector.load %arg2[%47, %c0_28, %c0_29] : memref<8x8x128xf32, #tpu.memory_space<vmem>>, vector<1x8x128xf32>
    %49 = vector.shape_cast %48 : vector<1x8x128xf32> to vector<8x128xf32>
    %cst_30 = arith.constant dense<0.000000e+00> : vector<8x384xf32>
    %50 = tpu.matmul %49, %3, %cst_30 {dimension_numbers = #tpu.dot_dimension_numbers<[1], [0], [0], [1], [0, 0, 1, 1], [], []>} : vector<8x128xf32>, vector<128x384xf32>, vector<8x384xf32> -> vector<8x384xf32>
    %51 = arith.addf %50, %7 : vector<8x384xf32>
    %52 = arith.index_cast %c4_i32 : i32 to index
    %c0_31 = arith.constant 0 : index
    %c0_32 = arith.constant 0 : index
    %53 = vector.load %arg10[%52, %c0_31, %c0_32] : memref<8x8x384xf32, #tpu.memory_space<vmem>>, vector<1x8x384xf32>
    %54 = vector.shape_cast %53 : vector<1x8x384xf32> to vector<8x384xf32>
    %55 = vector.shape_cast %51 : vector<8x384xf32> to vector<1x8x384xf32>
    tpu.vector_store %arg10[%52, %c0_31, %c0_32], %55 {strides = array<i32>} : memref<8x8x384xf32, #tpu.memory_space<vmem>>, vector<1x8x384xf32>,
    %c5_i32 = arith.constant 5 : i32
    %56 = arith.index_cast %c5_i32 : i32 to index
    %c0_33 = arith.constant 0 : index
    %c0_34 = arith.constant 0 : index
    %57 = vector.load %arg2[%56, %c0_33, %c0_34] : memref<8x8x128xf32, #tpu.memory_space<vmem>>, vector<1x8x128xf32>
    %58 = vector.shape_cast %57 : vector<1x8x128xf32> to vector<8x128xf32>
    %cst_35 = arith.constant dense<0.000000e+00> : vector<8x384xf32>
    %59 = tpu.matmul %58, %3, %cst_35 {dimension_numbers = #tpu.dot_dimension_numbers<[1], [0], [0], [1], [0, 0, 1, 1], [], []>} : vector<8x128xf32>, vector<128x384xf32>, vector<8x384xf32> -> vector<8x384xf32>
    %60 = arith.addf %59, %7 : vector<8x384xf32>
    %61 = arith.index_cast %c5_i32 : i32 to index
    %c0_36 = arith.constant 0 : index
    %c0_37 = arith.constant 0 : index
    %62 = vector.load %arg10[%61, %c0_36, %c0_37] : memref<8x8x384xf32, #tpu.memory_space<vmem>>, vector<1x8x384xf32>
    %63 = vector.shape_cast %62 : vector<1x8x384xf32> to vector<8x384xf32>
    %64 = vector.shape_cast %60 : vector<8x384xf32> to vector<1x8x384xf32>
    tpu.vector_store %arg10[%61, %c0_36, %c0_37], %64 {strides = array<i32>} : memref<8x8x384xf32, #tpu.memory_space<vmem>>, vector<1x8x384xf32>,
    %c6_i32 = arith.constant 6 : i32
    %65 = arith.index_cast %c6_i32 : i32 to index
    %c0_38 = arith.constant 0 : index
    %c0_39 = arith.constant 0 : index
    %66 = vector.load %arg2[%65, %c0_38, %c0_39] : memref<8x8x128xf32, #tpu.memory_space<vmem>>, vector<1x8x128xf32>
    %67 = vector.shape_cast %66 : vector<1x8x128xf32> to vector<8x128xf32>
    %cst_40 = arith.constant dense<0.000000e+00> : vector<8x384xf32>
    %68 = tpu.matmul %67, %3, %cst_40 {dimension_numbers = #tpu.dot_dimension_numbers<[1], [0], [0], [1], [0, 0, 1, 1], [], []>} : vector<8x128xf32>, vector<128x384xf32>, vector<8x384xf32> -> vector<8x384xf32>
    %69 = arith.addf %68, %7 : vector<8x384xf32>
    %70 = arith.index_cast %c6_i32 : i32 to index
    %c0_41 = arith.constant 0 : index
    %c0_42 = arith.constant 0 : index
    %71 = vector.load %arg10[%70, %c0_41, %c0_42] : memref<8x8x384xf32, #tpu.memory_space<vmem>>, vector<1x8x384xf32>
    %72 = vector.shape_cast %71 : vector<1x8x384xf32> to vector<8x384xf32>
    %73 = vector.shape_cast %69 : vector<8x384xf32> to vector<1x8x384xf32>
    tpu.vector_store %arg10[%70, %c0_41, %c0_42], %73 {strides = array<i32>} : memref<8x8x384xf32, #tpu.memory_space<vmem>>, vector<1x8x384xf32>,
    %c7_i32 = arith.constant 7 : i32
    %74 = arith.index_cast %c7_i32 : i32 to index
    %c0_43 = arith.constant 0 : index
    %c0_44 = arith.constant 0 : index
    %75 = vector.load %arg2[%74, %c0_43, %c0_44] : memref<8x8x128xf32, #tpu.memory_space<vmem>>, vector<1x8x128xf32>
    %76 = vector.shape_cast %75 : vector<1x8x128xf32> to vector<8x128xf32>
    %cst_45 = arith.constant dense<0.000000e+00> : vector<8x384xf32>
    %77 = tpu.matmul %76, %3, %cst_45 {dimension_numbers = #tpu.dot_dimension_numbers<[1], [0], [0], [1], [0, 0, 1, 1], [], []>} : vector<8x128xf32>, vector<128x384xf32>, vector<8x384xf32> -> vector<8x384xf32>
    %78 = arith.addf %77, %7 : vector<8x384xf32>
    %79 = arith.index_cast %c7_i32 : i32 to index
    %c0_46 = arith.constant 0 : index
    %c0_47 = arith.constant 0 : index
    %80 = vector.load %arg10[%79, %c0_46, %c0_47] : memref<8x8x384xf32, #tpu.memory_space<vmem>>, vector<1x8x384xf32>
    %81 = vector.shape_cast %80 : vector<1x8x384xf32> to vector<8x384xf32>
    %82 = vector.shape_cast %78 : vector<8x384xf32> to vector<1x8x384xf32>
    tpu.vector_store %arg10[%79, %c0_46, %c0_47], %82 {strides = array<i32>} : memref<8x8x384xf32, #tpu.memory_space<vmem>>, vector<1x8x384xf32>,
    %c8_i32 = arith.constant 8 : i32
    %c0_i32_48 = arith.constant 0 : i32
    %c0_49 = arith.constant 0 : index
    %c0_50 = arith.constant 0 : index
    %83 = vector.load %arg11[%c0_49, %c0_50] : memref<8x128xf32, #tpu.memory_space<vmem>>, vector<8x128xf32>
    %84 = arith.index_cast %c0_i32_48 : i32 to index
    %c0_51 = arith.constant 0 : index
    %c0_52 = arith.constant 0 : index
    %85 = vector.load %arg10[%84, %c0_51, %c0_52] : memref<8x8x384xf32, #tpu.memory_space<vmem>>, vector<1x8x384xf32>
    %86 = vector.shape_cast %85 : vector<1x8x384xf32> to vector<8x384xf32>
    %cst_53 = arith.constant dense<0.000000e+00> : vector<8x384xf32>
    %87 = tpu.matmul %83, %4, %cst_53 {dimension_numbers = #tpu.dot_dimension_numbers<[1], [0], [0], [1], [0, 0, 1, 1], [], []>} : vector<8x128xf32>, vector<128x384xf32>, vector<8x384xf32> -> vector<8x384xf32>
    %88 = vector.extract_strided_slice %86 {offsets = [0, 0], sizes = [8, 128], strides = [1, 1]} : vector<8x384xf32> to vector<8x128xf32>
    %89 = vector.extract_strided_slice %87 {offsets = [0, 0], sizes = [8, 128], strides = [1, 1]} : vector<8x384xf32> to vector<8x128xf32>
    %90 = arith.addf %88, %89 : vector<8x128xf32>
    %91 = arith.negf %90 : vector<8x128xf32>
    %92 = math.exp %91 : vector<8x128xf32>
    %cst_54 = arith.constant 1.000000e+00 : f32
    %93 = vector.broadcast %cst_54 : f32 to vector<8x128xf32>
    %94 = arith.addf %93, %92 : vector<8x128xf32>
    %95 = arith.divf %93, %94 : vector<8x128xf32>
    %96 = vector.extract_strided_slice %86 {offsets = [0, 128], sizes = [8, 128], strides = [1, 1]} : vector<8x384xf32> to vector<8x128xf32>
    %97 = vector.extract_strided_slice %87 {offsets = [0, 128], sizes = [8, 128], strides = [1, 1]} : vector<8x384xf32> to vector<8x128xf32>
    %98 = arith.addf %96, %97 : vector<8x128xf32>
    %99 = arith.negf %98 : vector<8x128xf32>
    %100 = math.exp %99 : vector<8x128xf32>
    %cst_55 = arith.constant 1.000000e+00 : f32
    %101 = vector.broadcast %cst_55 : f32 to vector<8x128xf32>
    %102 = arith.addf %101, %100 : vector<8x128xf32>
    %103 = arith.divf %101, %102 : vector<8x128xf32>
    %104 = vector.extract_strided_slice %86 {offsets = [0, 256], sizes = [8, 128], strides = [1, 1]} : vector<8x384xf32> to vector<8x128xf32>
    %105 = vector.extract_strided_slice %87 {offsets = [0, 256], sizes = [8, 128], strides = [1, 1]} : vector<8x384xf32> to vector<8x128xf32>
    %106 = arith.addf %105, %10 : vector<8x128xf32>
    %107 = arith.mulf %95, %106 : vector<8x128xf32>
    %108 = arith.addf %104, %107 : vector<8x128xf32>
    %109 = math.tanh %108 : vector<8x128xf32>
    %cst_56 = arith.constant 1.000000e+00 : f32
    %110 = vector.broadcast %cst_56 : f32 to vector<8x128xf32>
    %111 = arith.subf %110, %103 : vector<8x128xf32>
    %112 = arith.mulf %111, %109 : vector<8x128xf32>
    %113 = arith.mulf %103, %83 : vector<8x128xf32>
    %114 = arith.addf %112, %113 : vector<8x128xf32>
    %c0_57 = arith.constant 0 : index
    %c0_58 = arith.constant 0 : index
    %115 = vector.load %arg11[%c0_57, %c0_58] : memref<8x128xf32, #tpu.memory_space<vmem>>, vector<8x128xf32>
    tpu.vector_store %arg11[%c0_57, %c0_58], %114 {strides = array<i32>} : memref<8x128xf32, #tpu.memory_space<vmem>>, vector<8x128xf32>,
    %116 = arith.index_cast %c0_i32_48 : i32 to index
    %c0_59 = arith.constant 0 : index
    %c0_60 = arith.constant 0 : index
    %117 = vector.load %arg8[%116, %c0_59, %c0_60] : memref<8x8x128xf32, #tpu.memory_space<vmem>>, vector<1x8x128xf32>
    %118 = vector.shape_cast %117 : vector<1x8x128xf32> to vector<8x128xf32>
    %119 = vector.shape_cast %114 : vector<8x128xf32> to vector<1x8x128xf32>
    tpu.vector_store %arg8[%116, %c0_59, %c0_60], %119 {strides = array<i32>} : memref<8x8x128xf32, #tpu.memory_space<vmem>>, vector<1x8x128xf32>,
    %c1_i32_61 = arith.constant 1 : i32
    %c0_62 = arith.constant 0 : index
    %c0_63 = arith.constant 0 : index
    %120 = vector.load %arg11[%c0_62, %c0_63] : memref<8x128xf32, #tpu.memory_space<vmem>>, vector<8x128xf32>
    %121 = arith.index_cast %c1_i32_61 : i32 to index
    %c0_64 = arith.constant 0 : index
    %c0_65 = arith.constant 0 : index
    %122 = vector.load %arg10[%121, %c0_64, %c0_65] : memref<8x8x384xf32, #tpu.memory_space<vmem>>, vector<1x8x384xf32>
    %123 = vector.shape_cast %122 : vector<1x8x384xf32> to vector<8x384xf32>
    %cst_66 = arith.constant dense<0.000000e+00> : vector<8x384xf32>
    %124 = tpu.matmul %120, %4, %cst_66 {dimension_numbers = #tpu.dot_dimension_numbers<[1], [0], [0], [1], [0, 0, 1, 1], [], []>} : vector<8x128xf32>, vector<128x384xf32>, vector<8x384xf32> -> vector<8x384xf32>
    %125 = vector.extract_strided_slice %123 {offsets = [0, 0], sizes = [8, 128], strides = [1, 1]} : vector<8x384xf32> to vector<8x128xf32>
    %126 = vector.extract_strided_slice %124 {offsets = [0, 0], sizes = [8, 128], strides = [1, 1]} : vector<8x384xf32> to vector<8x128xf32>
    %127 = arith.addf %125, %126 : vector<8x128xf32>
    %128 = arith.negf %127 : vector<8x128xf32>
    %129 = math.exp %128 : vector<8x128xf32>
    %cst_67 = arith.constant 1.000000e+00 : f32
    %130 = vector.broadcast %cst_67 : f32 to vector<8x128xf32>
    %131 = arith.addf %130, %129 : vector<8x128xf32>
    %132 = arith.divf %130, %131 : vector<8x128xf32>
    %133 = vector.extract_strided_slice %123 {offsets = [0, 128], sizes = [8, 128], strides = [1, 1]} : vector<8x384xf32> to vector<8x128xf32>
    %134 = vector.extract_strided_slice %124 {offsets = [0, 128], sizes = [8, 128], strides = [1, 1]} : vector<8x384xf32> to vector<8x128xf32>
    %135 = arith.addf %133, %134 : vector<8x128xf32>
    %136 = arith.negf %135 : vector<8x128xf32>
    %137 = math.exp %136 : vector<8x128xf32>
    %cst_68 = arith.constant 1.000000e+00 : f32
    %138 = vector.broadcast %cst_68 : f32 to vector<8x128xf32>
    %139 = arith.addf %138, %137 : vector<8x128xf32>
    %140 = arith.divf %138, %139 : vector<8x128xf32>
    %141 = vector.extract_strided_slice %123 {offsets = [0, 256], sizes = [8, 128], strides = [1, 1]} : vector<8x384xf32> to vector<8x128xf32>
    %142 = vector.extract_strided_slice %124 {offsets = [0, 256], sizes = [8, 128], strides = [1, 1]} : vector<8x384xf32> to vector<8x128xf32>
    %143 = arith.addf %142, %10 : vector<8x128xf32>
    %144 = arith.mulf %132, %143 : vector<8x128xf32>
    %145 = arith.addf %141, %144 : vector<8x128xf32>
    %146 = math.tanh %145 : vector<8x128xf32>
    %cst_69 = arith.constant 1.000000e+00 : f32
    %147 = vector.broadcast %cst_69 : f32 to vector<8x128xf32>
    %148 = arith.subf %147, %140 : vector<8x128xf32>
    %149 = arith.mulf %148, %146 : vector<8x128xf32>
    %150 = arith.mulf %140, %120 : vector<8x128xf32>
    %151 = arith.addf %149, %150 : vector<8x128xf32>
    %c0_70 = arith.constant 0 : index
    %c0_71 = arith.constant 0 : index
    %152 = vector.load %arg11[%c0_70, %c0_71] : memref<8x128xf32, #tpu.memory_space<vmem>>, vector<8x128xf32>
    tpu.vector_store %arg11[%c0_70, %c0_71], %151 {strides = array<i32>} : memref<8x128xf32, #tpu.memory_space<vmem>>, vector<8x128xf32>,
    %153 = arith.index_cast %c1_i32_61 : i32 to index
    %c0_72 = arith.constant 0 : index
    %c0_73 = arith.constant 0 : index
    %154 = vector.load %arg8[%153, %c0_72, %c0_73] : memref<8x8x128xf32, #tpu.memory_space<vmem>>, vector<1x8x128xf32>
    %155 = vector.shape_cast %154 : vector<1x8x128xf32> to vector<8x128xf32>
    %156 = vector.shape_cast %151 : vector<8x128xf32> to vector<1x8x128xf32>
    tpu.vector_store %arg8[%153, %c0_72, %c0_73], %156 {strides = array<i32>} : memref<8x8x128xf32, #tpu.memory_space<vmem>>, vector<1x8x128xf32>,
    %c2_i32_74 = arith.constant 2 : i32
    %c0_75 = arith.constant 0 : index
    %c0_76 = arith.constant 0 : index
    %157 = vector.load %arg11[%c0_75, %c0_76] : memref<8x128xf32, #tpu.memory_space<vmem>>, vector<8x128xf32>
    %158 = arith.index_cast %c2_i32_74 : i32 to index
    %c0_77 = arith.constant 0 : index
    %c0_78 = arith.constant 0 : index
    %159 = vector.load %arg10[%158, %c0_77, %c0_78] : memref<8x8x384xf32, #tpu.memory_space<vmem>>, vector<1x8x384xf32>
    %160 = vector.shape_cast %159 : vector<1x8x384xf32> to vector<8x384xf32>
    %cst_79 = arith.constant dense<0.000000e+00> : vector<8x384xf32>
    %161 = tpu.matmul %157, %4, %cst_79 {dimension_numbers = #tpu.dot_dimension_numbers<[1], [0], [0], [1], [0, 0, 1, 1], [], []>} : vector<8x128xf32>, vector<128x384xf32>, vector<8x384xf32> -> vector<8x384xf32>
    %162 = vector.extract_strided_slice %160 {offsets = [0, 0], sizes = [8, 128], strides = [1, 1]} : vector<8x384xf32> to vector<8x128xf32>
    %163 = vector.extract_strided_slice %161 {offsets = [0, 0], sizes = [8, 128], strides = [1, 1]} : vector<8x384xf32> to vector<8x128xf32>
    %164 = arith.addf %162, %163 : vector<8x128xf32>
    %165 = arith.negf %164 : vector<8x128xf32>
    %166 = math.exp %165 : vector<8x128xf32>
    %cst_80 = arith.constant 1.000000e+00 : f32
    %167 = vector.broadcast %cst_80 : f32 to vector<8x128xf32>
    %168 = arith.addf %167, %166 : vector<8x128xf32>
    %169 = arith.divf %167, %168 : vector<8x128xf32>
    %170 = vector.extract_strided_slice %160 {offsets = [0, 128], sizes = [8, 128], strides = [1, 1]} : vector<8x384xf32> to vector<8x128xf32>
    %171 = vector.extract_strided_slice %161 {offsets = [0, 128], sizes = [8, 128], strides = [1, 1]} : vector<8x384xf32> to vector<8x128xf32>
    %172 = arith.addf %170, %171 : vector<8x128xf32>
    %173 = arith.negf %172 : vector<8x128xf32>
    %174 = math.exp %173 : vector<8x128xf32>
    %cst_81 = arith.constant 1.000000e+00 : f32
    %175 = vector.broadcast %cst_81 : f32 to vector<8x128xf32>
    %176 = arith.addf %175, %174 : vector<8x128xf32>
    %177 = arith.divf %175, %176 : vector<8x128xf32>
    %178 = vector.extract_strided_slice %160 {offsets = [0, 256], sizes = [8, 128], strides = [1, 1]} : vector<8x384xf32> to vector<8x128xf32>
    %179 = vector.extract_strided_slice %161 {offsets = [0, 256], sizes = [8, 128], strides = [1, 1]} : vector<8x384xf32> to vector<8x128xf32>
    %180 = arith.addf %179, %10 : vector<8x128xf32>
    %181 = arith.mulf %169, %180 : vector<8x128xf32>
    %182 = arith.addf %178, %181 : vector<8x128xf32>
    %183 = math.tanh %182 : vector<8x128xf32>
    %cst_82 = arith.constant 1.000000e+00 : f32
    %184 = vector.broadcast %cst_82 : f32 to vector<8x128xf32>
    %185 = arith.subf %184, %177 : vector<8x128xf32>
    %186 = arith.mulf %185, %183 : vector<8x128xf32>
    %187 = arith.mulf %177, %157 : vector<8x128xf32>
    %188 = arith.addf %186, %187 : vector<8x128xf32>
    %c0_83 = arith.constant 0 : index
    %c0_84 = arith.constant 0 : index
    %189 = vector.load %arg11[%c0_83, %c0_84] : memref<8x128xf32, #tpu.memory_space<vmem>>, vector<8x128xf32>
    tpu.vector_store %arg11[%c0_83, %c0_84], %188 {strides = array<i32>} : memref<8x128xf32, #tpu.memory_space<vmem>>, vector<8x128xf32>,
    %190 = arith.index_cast %c2_i32_74 : i32 to index
    %c0_85 = arith.constant 0 : index
    %c0_86 = arith.constant 0 : index
    %191 = vector.load %arg8[%190, %c0_85, %c0_86] : memref<8x8x128xf32, #tpu.memory_space<vmem>>, vector<1x8x128xf32>
    %192 = vector.shape_cast %191 : vector<1x8x128xf32> to vector<8x128xf32>
    %193 = vector.shape_cast %188 : vector<8x128xf32> to vector<1x8x128xf32>
    tpu.vector_store %arg8[%190, %c0_85, %c0_86], %193 {strides = array<i32>} : memref<8x8x128xf32, #tpu.memory_space<vmem>>, vector<1x8x128xf32>,
    %c3_i32_87 = arith.constant 3 : i32
    %c0_88 = arith.constant 0 : index
    %c0_89 = arith.constant 0 : index
    %194 = vector.load %arg11[%c0_88, %c0_89] : memref<8x128xf32, #tpu.memory_space<vmem>>, vector<8x128xf32>
    %195 = arith.index_cast %c3_i32_87 : i32 to index
    %c0_90 = arith.constant 0 : index
    %c0_91 = arith.constant 0 : index
    %196 = vector.load %arg10[%195, %c0_90, %c0_91] : memref<8x8x384xf32, #tpu.memory_space<vmem>>, vector<1x8x384xf32>
    %197 = vector.shape_cast %196 : vector<1x8x384xf32> to vector<8x384xf32>
    %cst_92 = arith.constant dense<0.000000e+00> : vector<8x384xf32>
    %198 = tpu.matmul %194, %4, %cst_92 {dimension_numbers = #tpu.dot_dimension_numbers<[1], [0], [0], [1], [0, 0, 1, 1], [], []>} : vector<8x128xf32>, vector<128x384xf32>, vector<8x384xf32> -> vector<8x384xf32>
    %199 = vector.extract_strided_slice %197 {offsets = [0, 0], sizes = [8, 128], strides = [1, 1]} : vector<8x384xf32> to vector<8x128xf32>
    %200 = vector.extract_strided_slice %198 {offsets = [0, 0], sizes = [8, 128], strides = [1, 1]} : vector<8x384xf32> to vector<8x128xf32>
    %201 = arith.addf %199, %200 : vector<8x128xf32>
    %202 = arith.negf %201 : vector<8x128xf32>
    %203 = math.exp %202 : vector<8x128xf32>
    %cst_93 = arith.constant 1.000000e+00 : f32
    %204 = vector.broadcast %cst_93 : f32 to vector<8x128xf32>
    %205 = arith.addf %204, %203 : vector<8x128xf32>
    %206 = arith.divf %204, %205 : vector<8x128xf32>
    %207 = vector.extract_strided_slice %197 {offsets = [0, 128], sizes = [8, 128], strides = [1, 1]} : vector<8x384xf32> to vector<8x128xf32>
    %208 = vector.extract_strided_slice %198 {offsets = [0, 128], sizes = [8, 128], strides = [1, 1]} : vector<8x384xf32> to vector<8x128xf32>
    %209 = arith.addf %207, %208 : vector<8x128xf32>
    %210 = arith.negf %209 : vector<8x128xf32>
    %211 = math.exp %210 : vector<8x128xf32>
    %cst_94 = arith.constant 1.000000e+00 : f32
    %212 = vector.broadcast %cst_94 : f32 to vector<8x128xf32>
    %213 = arith.addf %212, %211 : vector<8x128xf32>
    %214 = arith.divf %212, %213 : vector<8x128xf32>
    %215 = vector.extract_strided_slice %197 {offsets = [0, 256], sizes = [8, 128], strides = [1, 1]} : vector<8x384xf32> to vector<8x128xf32>
    %216 = vector.extract_strided_slice %198 {offsets = [0, 256], sizes = [8, 128], strides = [1, 1]} : vector<8x384xf32> to vector<8x128xf32>
    %217 = arith.addf %216, %10 : vector<8x128xf32>
    %218 = arith.mulf %206, %217 : vector<8x128xf32>
    %219 = arith.addf %215, %218 : vector<8x128xf32>
    %220 = math.tanh %219 : vector<8x128xf32>
    %cst_95 = arith.constant 1.000000e+00 : f32
    %221 = vector.broadcast %cst_95 : f32 to vector<8x128xf32>
    %222 = arith.subf %221, %214 : vector<8x128xf32>
    %223 = arith.mulf %222, %220 : vector<8x128xf32>
    %224 = arith.mulf %214, %194 : vector<8x128xf32>
    %225 = arith.addf %223, %224 : vector<8x128xf32>
    %c0_96 = arith.constant 0 : index
    %c0_97 = arith.constant 0 : index
    %226 = vector.load %arg11[%c0_96, %c0_97] : memref<8x128xf32, #tpu.memory_space<vmem>>, vector<8x128xf32>
    tpu.vector_store %arg11[%c0_96, %c0_97], %225 {strides = array<i32>} : memref<8x128xf32, #tpu.memory_space<vmem>>, vector<8x128xf32>,
    %227 = arith.index_cast %c3_i32_87 : i32 to index
    %c0_98 = arith.constant 0 : index
    %c0_99 = arith.constant 0 : index
    %228 = vector.load %arg8[%227, %c0_98, %c0_99] : memref<8x8x128xf32, #tpu.memory_space<vmem>>, vector<1x8x128xf32>
    %229 = vector.shape_cast %228 : vector<1x8x128xf32> to vector<8x128xf32>
    %230 = vector.shape_cast %225 : vector<8x128xf32> to vector<1x8x128xf32>
    tpu.vector_store %arg8[%227, %c0_98, %c0_99], %230 {strides = array<i32>} : memref<8x8x128xf32, #tpu.memory_space<vmem>>, vector<1x8x128xf32>,
    %c4_i32_100 = arith.constant 4 : i32
    %c0_101 = arith.constant 0 : index
    %c0_102 = arith.constant 0 : index
    %231 = vector.load %arg11[%c0_101, %c0_102] : memref<8x128xf32, #tpu.memory_space<vmem>>, vector<8x128xf32>
    %232 = arith.index_cast %c4_i32_100 : i32 to index
    %c0_103 = arith.constant 0 : index
    %c0_104 = arith.constant 0 : index
    %233 = vector.load %arg10[%232, %c0_103, %c0_104] : memref<8x8x384xf32, #tpu.memory_space<vmem>>, vector<1x8x384xf32>
    %234 = vector.shape_cast %233 : vector<1x8x384xf32> to vector<8x384xf32>
    %cst_105 = arith.constant dense<0.000000e+00> : vector<8x384xf32>
    %235 = tpu.matmul %231, %4, %cst_105 {dimension_numbers = #tpu.dot_dimension_numbers<[1], [0], [0], [1], [0, 0, 1, 1], [], []>} : vector<8x128xf32>, vector<128x384xf32>, vector<8x384xf32> -> vector<8x384xf32>
    %236 = vector.extract_strided_slice %234 {offsets = [0, 0], sizes = [8, 128], strides = [1, 1]} : vector<8x384xf32> to vector<8x128xf32>
    %237 = vector.extract_strided_slice %235 {offsets = [0, 0], sizes = [8, 128], strides = [1, 1]} : vector<8x384xf32> to vector<8x128xf32>
    %238 = arith.addf %236, %237 : vector<8x128xf32>
    %239 = arith.negf %238 : vector<8x128xf32>
    %240 = math.exp %239 : vector<8x128xf32>
    %cst_106 = arith.constant 1.000000e+00 : f32
    %241 = vector.broadcast %cst_106 : f32 to vector<8x128xf32>
    %242 = arith.addf %241, %240 : vector<8x128xf32>
    %243 = arith.divf %241, %242 : vector<8x128xf32>
    %244 = vector.extract_strided_slice %234 {offsets = [0, 128], sizes = [8, 128], strides = [1, 1]} : vector<8x384xf32> to vector<8x128xf32>
    %245 = vector.extract_strided_slice %235 {offsets = [0, 128], sizes = [8, 128], strides = [1, 1]} : vector<8x384xf32> to vector<8x128xf32>
    %246 = arith.addf %244, %245 : vector<8x128xf32>
    %247 = arith.negf %246 : vector<8x128xf32>
    %248 = math.exp %247 : vector<8x128xf32>
    %cst_107 = arith.constant 1.000000e+00 : f32
    %249 = vector.broadcast %cst_107 : f32 to vector<8x128xf32>
    %250 = arith.addf %249, %248 : vector<8x128xf32>
    %251 = arith.divf %249, %250 : vector<8x128xf32>
    %252 = vector.extract_strided_slice %234 {offsets = [0, 256], sizes = [8, 128], strides = [1, 1]} : vector<8x384xf32> to vector<8x128xf32>
    %253 = vector.extract_strided_slice %235 {offsets = [0, 256], sizes = [8, 128], strides = [1, 1]} : vector<8x384xf32> to vector<8x128xf32>
    %254 = arith.addf %253, %10 : vector<8x128xf32>
    %255 = arith.mulf %243, %254 : vector<8x128xf32>
    %256 = arith.addf %252, %255 : vector<8x128xf32>
    %257 = math.tanh %256 : vector<8x128xf32>
    %cst_108 = arith.constant 1.000000e+00 : f32
    %258 = vector.broadcast %cst_108 : f32 to vector<8x128xf32>
    %259 = arith.subf %258, %251 : vector<8x128xf32>
    %260 = arith.mulf %259, %257 : vector<8x128xf32>
    %261 = arith.mulf %251, %231 : vector<8x128xf32>
    %262 = arith.addf %260, %261 : vector<8x128xf32>
    %c0_109 = arith.constant 0 : index
    %c0_110 = arith.constant 0 : index
    %263 = vector.load %arg11[%c0_109, %c0_110] : memref<8x128xf32, #tpu.memory_space<vmem>>, vector<8x128xf32>
    tpu.vector_store %arg11[%c0_109, %c0_110], %262 {strides = array<i32>} : memref<8x128xf32, #tpu.memory_space<vmem>>, vector<8x128xf32>,
    %264 = arith.index_cast %c4_i32_100 : i32 to index
    %c0_111 = arith.constant 0 : index
    %c0_112 = arith.constant 0 : index
    %265 = vector.load %arg8[%264, %c0_111, %c0_112] : memref<8x8x128xf32, #tpu.memory_space<vmem>>, vector<1x8x128xf32>
    %266 = vector.shape_cast %265 : vector<1x8x128xf32> to vector<8x128xf32>
    %267 = vector.shape_cast %262 : vector<8x128xf32> to vector<1x8x128xf32>
    tpu.vector_store %arg8[%264, %c0_111, %c0_112], %267 {strides = array<i32>} : memref<8x8x128xf32, #tpu.memory_space<vmem>>, vector<1x8x128xf32>,
    %c5_i32_113 = arith.constant 5 : i32
    %c0_114 = arith.constant 0 : index
    %c0_115 = arith.constant 0 : index
    %268 = vector.load %arg11[%c0_114, %c0_115] : memref<8x128xf32, #tpu.memory_space<vmem>>, vector<8x128xf32>
    %269 = arith.index_cast %c5_i32_113 : i32 to index
    %c0_116 = arith.constant 0 : index
    %c0_117 = arith.constant 0 : index
    %270 = vector.load %arg10[%269, %c0_116, %c0_117] : memref<8x8x384xf32, #tpu.memory_space<vmem>>, vector<1x8x384xf32>
    %271 = vector.shape_cast %270 : vector<1x8x384xf32> to vector<8x384xf32>
    %cst_118 = arith.constant dense<0.000000e+00> : vector<8x384xf32>
    %272 = tpu.matmul %268, %4, %cst_118 {dimension_numbers = #tpu.dot_dimension_numbers<[1], [0], [0], [1], [0, 0, 1, 1], [], []>} : vector<8x128xf32>, vector<128x384xf32>, vector<8x384xf32> -> vector<8x384xf32>
    %273 = vector.extract_strided_slice %271 {offsets = [0, 0], sizes = [8, 128], strides = [1, 1]} : vector<8x384xf32> to vector<8x128xf32>
    %274 = vector.extract_strided_slice %272 {offsets = [0, 0], sizes = [8, 128], strides = [1, 1]} : vector<8x384xf32> to vector<8x128xf32>
    %275 = arith.addf %273, %274 : vector<8x128xf32>
    %276 = arith.negf %275 : vector<8x128xf32>
    %277 = math.exp %276 : vector<8x128xf32>
    %cst_119 = arith.constant 1.000000e+00 : f32
    %278 = vector.broadcast %cst_119 : f32 to vector<8x128xf32>
    %279 = arith.addf %278, %277 : vector<8x128xf32>
    %280 = arith.divf %278, %279 : vector<8x128xf32>
    %281 = vector.extract_strided_slice %271 {offsets = [0, 128], sizes = [8, 128], strides = [1, 1]} : vector<8x384xf32> to vector<8x128xf32>
    %282 = vector.extract_strided_slice %272 {offsets = [0, 128], sizes = [8, 128], strides = [1, 1]} : vector<8x384xf32> to vector<8x128xf32>
    %283 = arith.addf %281, %282 : vector<8x128xf32>
    %284 = arith.negf %283 : vector<8x128xf32>
    %285 = math.exp %284 : vector<8x128xf32>
    %cst_120 = arith.constant 1.000000e+00 : f32
    %286 = vector.broadcast %cst_120 : f32 to vector<8x128xf32>
    %287 = arith.addf %286, %285 : vector<8x128xf32>
    %288 = arith.divf %286, %287 : vector<8x128xf32>
    %289 = vector.extract_strided_slice %271 {offsets = [0, 256], sizes = [8, 128], strides = [1, 1]} : vector<8x384xf32> to vector<8x128xf32>
    %290 = vector.extract_strided_slice %272 {offsets = [0, 256], sizes = [8, 128], strides = [1, 1]} : vector<8x384xf32> to vector<8x128xf32>
    %291 = arith.addf %290, %10 : vector<8x128xf32>
    %292 = arith.mulf %280, %291 : vector<8x128xf32>
    %293 = arith.addf %289, %292 : vector<8x128xf32>
    %294 = math.tanh %293 : vector<8x128xf32>
    %cst_121 = arith.constant 1.000000e+00 : f32
    %295 = vector.broadcast %cst_121 : f32 to vector<8x128xf32>
    %296 = arith.subf %295, %288 : vector<8x128xf32>
    %297 = arith.mulf %296, %294 : vector<8x128xf32>
    %298 = arith.mulf %288, %268 : vector<8x128xf32>
    %299 = arith.addf %297, %298 : vector<8x128xf32>
    %c0_122 = arith.constant 0 : index
    %c0_123 = arith.constant 0 : index
    %300 = vector.load %arg11[%c0_122, %c0_123] : memref<8x128xf32, #tpu.memory_space<vmem>>, vector<8x128xf32>
    tpu.vector_store %arg11[%c0_122, %c0_123], %299 {strides = array<i32>} : memref<8x128xf32, #tpu.memory_space<vmem>>, vector<8x128xf32>,
    %301 = arith.index_cast %c5_i32_113 : i32 to index
    %c0_124 = arith.constant 0 : index
    %c0_125 = arith.constant 0 : index
    %302 = vector.load %arg8[%301, %c0_124, %c0_125] : memref<8x8x128xf32, #tpu.memory_space<vmem>>, vector<1x8x128xf32>
    %303 = vector.shape_cast %302 : vector<1x8x128xf32> to vector<8x128xf32>
    %304 = vector.shape_cast %299 : vector<8x128xf32> to vector<1x8x128xf32>
    tpu.vector_store %arg8[%301, %c0_124, %c0_125], %304 {strides = array<i32>} : memref<8x8x128xf32, #tpu.memory_space<vmem>>, vector<1x8x128xf32>,
    %c6_i32_126 = arith.constant 6 : i32
    %c0_127 = arith.constant 0 : index
    %c0_128 = arith.constant 0 : index
    %305 = vector.load %arg11[%c0_127, %c0_128] : memref<8x128xf32, #tpu.memory_space<vmem>>, vector<8x128xf32>
    %306 = arith.index_cast %c6_i32_126 : i32 to index
    %c0_129 = arith.constant 0 : index
    %c0_130 = arith.constant 0 : index
    %307 = vector.load %arg10[%306, %c0_129, %c0_130] : memref<8x8x384xf32, #tpu.memory_space<vmem>>, vector<1x8x384xf32>
    %308 = vector.shape_cast %307 : vector<1x8x384xf32> to vector<8x384xf32>
    %cst_131 = arith.constant dense<0.000000e+00> : vector<8x384xf32>
    %309 = tpu.matmul %305, %4, %cst_131 {dimension_numbers = #tpu.dot_dimension_numbers<[1], [0], [0], [1], [0, 0, 1, 1], [], []>} : vector<8x128xf32>, vector<128x384xf32>, vector<8x384xf32> -> vector<8x384xf32>
    %310 = vector.extract_strided_slice %308 {offsets = [0, 0], sizes = [8, 128], strides = [1, 1]} : vector<8x384xf32> to vector<8x128xf32>
    %311 = vector.extract_strided_slice %309 {offsets = [0, 0], sizes = [8, 128], strides = [1, 1]} : vector<8x384xf32> to vector<8x128xf32>
    %312 = arith.addf %310, %311 : vector<8x128xf32>
    %313 = arith.negf %312 : vector<8x128xf32>
    %314 = math.exp %313 : vector<8x128xf32>
    %cst_132 = arith.constant 1.000000e+00 : f32
    %315 = vector.broadcast %cst_132 : f32 to vector<8x128xf32>
    %316 = arith.addf %315, %314 : vector<8x128xf32>
    %317 = arith.divf %315, %316 : vector<8x128xf32>
    %318 = vector.extract_strided_slice %308 {offsets = [0, 128], sizes = [8, 128], strides = [1, 1]} : vector<8x384xf32> to vector<8x128xf32>
    %319 = vector.extract_strided_slice %309 {offsets = [0, 128], sizes = [8, 128], strides = [1, 1]} : vector<8x384xf32> to vector<8x128xf32>
    %320 = arith.addf %318, %319 : vector<8x128xf32>
    %321 = arith.negf %320 : vector<8x128xf32>
    %322 = math.exp %321 : vector<8x128xf32>
    %cst_133 = arith.constant 1.000000e+00 : f32
    %323 = vector.broadcast %cst_133 : f32 to vector<8x128xf32>
    %324 = arith.addf %323, %322 : vector<8x128xf32>
    %325 = arith.divf %323, %324 : vector<8x128xf32>
    %326 = vector.extract_strided_slice %308 {offsets = [0, 256], sizes = [8, 128], strides = [1, 1]} : vector<8x384xf32> to vector<8x128xf32>
    %327 = vector.extract_strided_slice %309 {offsets = [0, 256], sizes = [8, 128], strides = [1, 1]} : vector<8x384xf32> to vector<8x128xf32>
    %328 = arith.addf %327, %10 : vector<8x128xf32>
    %329 = arith.mulf %317, %328 : vector<8x128xf32>
    %330 = arith.addf %326, %329 : vector<8x128xf32>
    %331 = math.tanh %330 : vector<8x128xf32>
    %cst_134 = arith.constant 1.000000e+00 : f32
    %332 = vector.broadcast %cst_134 : f32 to vector<8x128xf32>
    %333 = arith.subf %332, %325 : vector<8x128xf32>
    %334 = arith.mulf %333, %331 : vector<8x128xf32>
    %335 = arith.mulf %325, %305 : vector<8x128xf32>
    %336 = arith.addf %334, %335 : vector<8x128xf32>
    %c0_135 = arith.constant 0 : index
    %c0_136 = arith.constant 0 : index
    %337 = vector.load %arg11[%c0_135, %c0_136] : memref<8x128xf32, #tpu.memory_space<vmem>>, vector<8x128xf32>
    tpu.vector_store %arg11[%c0_135, %c0_136], %336 {strides = array<i32>} : memref<8x128xf32, #tpu.memory_space<vmem>>, vector<8x128xf32>,
    %338 = arith.index_cast %c6_i32_126 : i32 to index
    %c0_137 = arith.constant 0 : index
    %c0_138 = arith.constant 0 : index
    %339 = vector.load %arg8[%338, %c0_137, %c0_138] : memref<8x8x128xf32, #tpu.memory_space<vmem>>, vector<1x8x128xf32>
    %340 = vector.shape_cast %339 : vector<1x8x128xf32> to vector<8x128xf32>
    %341 = vector.shape_cast %336 : vector<8x128xf32> to vector<1x8x128xf32>
    tpu.vector_store %arg8[%338, %c0_137, %c0_138], %341 {strides = array<i32>} : memref<8x8x128xf32, #tpu.memory_space<vmem>>, vector<1x8x128xf32>,
    %c7_i32_139 = arith.constant 7 : i32
    %c0_140 = arith.constant 0 : index
    %c0_141 = arith.constant 0 : index
    %342 = vector.load %arg11[%c0_140, %c0_141] : memref<8x128xf32, #tpu.memory_space<vmem>>, vector<8x128xf32>
    %343 = arith.index_cast %c7_i32_139 : i32 to index
    %c0_142 = arith.constant 0 : index
    %c0_143 = arith.constant 0 : index
    %344 = vector.load %arg10[%343, %c0_142, %c0_143] : memref<8x8x384xf32, #tpu.memory_space<vmem>>, vector<1x8x384xf32>
    %345 = vector.shape_cast %344 : vector<1x8x384xf32> to vector<8x384xf32>
    %cst_144 = arith.constant dense<0.000000e+00> : vector<8x384xf32>
    %346 = tpu.matmul %342, %4, %cst_144 {dimension_numbers = #tpu.dot_dimension_numbers<[1], [0], [0], [1], [0, 0, 1, 1], [], []>} : vector<8x128xf32>, vector<128x384xf32>, vector<8x384xf32> -> vector<8x384xf32>
    %347 = vector.extract_strided_slice %345 {offsets = [0, 0], sizes = [8, 128], strides = [1, 1]} : vector<8x384xf32> to vector<8x128xf32>
    %348 = vector.extract_strided_slice %346 {offsets = [0, 0], sizes = [8, 128], strides = [1, 1]} : vector<8x384xf32> to vector<8x128xf32>
    %349 = arith.addf %347, %348 : vector<8x128xf32>
    %350 = arith.negf %349 : vector<8x128xf32>
    %351 = math.exp %350 : vector<8x128xf32>
    %cst_145 = arith.constant 1.000000e+00 : f32
    %352 = vector.broadcast %cst_145 : f32 to vector<8x128xf32>
    %353 = arith.addf %352, %351 : vector<8x128xf32>
    %354 = arith.divf %352, %353 : vector<8x128xf32>
    %355 = vector.extract_strided_slice %345 {offsets = [0, 128], sizes = [8, 128], strides = [1, 1]} : vector<8x384xf32> to vector<8x128xf32>
    %356 = vector.extract_strided_slice %346 {offsets = [0, 128], sizes = [8, 128], strides = [1, 1]} : vector<8x384xf32> to vector<8x128xf32>
    %357 = arith.addf %355, %356 : vector<8x128xf32>
    %358 = arith.negf %357 : vector<8x128xf32>
    %359 = math.exp %358 : vector<8x128xf32>
    %cst_146 = arith.constant 1.000000e+00 : f32
    %360 = vector.broadcast %cst_146 : f32 to vector<8x128xf32>
    %361 = arith.addf %360, %359 : vector<8x128xf32>
    %362 = arith.divf %360, %361 : vector<8x128xf32>
    %363 = vector.extract_strided_slice %345 {offsets = [0, 256], sizes = [8, 128], strides = [1, 1]} : vector<8x384xf32> to vector<8x128xf32>
    %364 = vector.extract_strided_slice %346 {offsets = [0, 256], sizes = [8, 128], strides = [1, 1]} : vector<8x384xf32> to vector<8x128xf32>
    %365 = arith.addf %364, %10 : vector<8x128xf32>
    %366 = arith.mulf %354, %365 : vector<8x128xf32>
    %367 = arith.addf %363, %366 : vector<8x128xf32>
    %368 = math.tanh %367 : vector<8x128xf32>
    %cst_147 = arith.constant 1.000000e+00 : f32
    %369 = vector.broadcast %cst_147 : f32 to vector<8x128xf32>
    %370 = arith.subf %369, %362 : vector<8x128xf32>
    %371 = arith.mulf %370, %368 : vector<8x128xf32>
    %372 = arith.mulf %362, %342 : vector<8x128xf32>
    %373 = arith.addf %371, %372 : vector<8x128xf32>
    %c0_148 = arith.constant 0 : index
    %c0_149 = arith.constant 0 : index
    %374 = vector.load %arg11[%c0_148, %c0_149] : memref<8x128xf32, #tpu.memory_space<vmem>>, vector<8x128xf32>
    tpu.vector_store %arg11[%c0_148, %c0_149], %373 {strides = array<i32>} : memref<8x128xf32, #tpu.memory_space<vmem>>, vector<8x128xf32>,
    %375 = arith.index_cast %c7_i32_139 : i32 to index
    %c0_150 = arith.constant 0 : index
    %c0_151 = arith.constant 0 : index
    %376 = vector.load %arg8[%375, %c0_150, %c0_151] : memref<8x8x128xf32, #tpu.memory_space<vmem>>, vector<1x8x128xf32>
    %377 = vector.shape_cast %376 : vector<1x8x128xf32> to vector<8x128xf32>
    %378 = vector.shape_cast %373 : vector<8x128xf32> to vector<1x8x128xf32>
    tpu.vector_store %arg8[%375, %c0_150, %c0_151], %378 {strides = array<i32>} : memref<8x8x128xf32, #tpu.memory_space<vmem>>, vector<1x8x128xf32>,
    %c8_i32_152 = arith.constant 8 : i32
    %c0_i32_153 = arith.constant 0 : i32
    %379 = arith.cmpi eq, %arg1, %c0_i32_153 : i32
    %380 = arith.extui %379 : i1 to i32
    %c0_i32_154 = arith.constant 0 : i32
    %381 = arith.cmpi ne, %380, %c0_i32_154 : i32
    scf.if %381 {
      %c0_155 = arith.constant 0 : index
      %c0_156 = arith.constant 0 : index
      %382 = vector.load %arg11[%c0_155, %c0_156] : memref<8x128xf32, #tpu.memory_space<vmem>>, vector<8x128xf32>
      %c0_157 = arith.constant 0 : index
      %c0_158 = arith.constant 0 : index
      %383 = vector.load %arg9[%c0_157, %c0_158] : memref<8x128xf32, #tpu.memory_space<vmem>>, vector<8x128xf32>
      tpu.vector_store %arg9[%c0_157, %c0_158], %382 {strides = array<i32>} : memref<8x128xf32, #tpu.memory_space<vmem>>, vector<8x128xf32>,
    } else {
    }
    return
  }
  func.func @transform_0(%arg0: i32, %arg1: i32) -> (i32, i32, i32) {
    %c0_i32 = arith.constant 0 : i32
    %c0_i32_0 = arith.constant 0 : i32
    return %arg1, %arg0, %c0_i32 : i32, i32, i32
  }
  func.func @transform_1(%arg0: i32, %arg1: i32) -> (i32, i32) {
    %c0_i32 = arith.constant 0 : i32
    %c0_i32_0 = arith.constant 0 : i32
    return %arg0, %c0_i32 : i32, i32
  }
  func.func @transform_2(%arg0: i32, %arg1: i32) -> (i32, i32) {
    %c0_i32 = arith.constant 0 : i32
    %c0_i32_0 = arith.constant 0 : i32
    %c0_i32_1 = arith.constant 0 : i32
    return %c0_i32, %c0_i32_0 : i32, i32
  }
  func.func @transform_3(%arg0: i32, %arg1: i32) -> (i32, i32) {
    %c0_i32 = arith.constant 0 : i32
    %c0_i32_0 = arith.constant 0 : i32
    %c0_i32_1 = arith.constant 0 : i32
    return %c0_i32, %c0_i32_0 : i32, i32
  }
  func.func @transform_4(%arg0: i32, %arg1: i32) -> (i32, i32) {
    %c0_i32 = arith.constant 0 : i32
    %c0_i32_0 = arith.constant 0 : i32
    %c0_i32_1 = arith.constant 0 : i32
    return %c0_i32, %c0_i32_0 : i32, i32
  }
  func.func @transform_5(%arg0: i32, %arg1: i32) -> (i32, i32) {
    %c0_i32 = arith.constant 0 : i32
    %c0_i32_0 = arith.constant 0 : i32
    %c0_i32_1 = arith.constant 0 : i32
    return %c0_i32, %c0_i32_0 : i32, i32
  }
  func.func @transform_6(%arg0: i32, %arg1: i32) -> (i32, i32, i32) {
    %c0_i32 = arith.constant 0 : i32
    %c0_i32_0 = arith.constant 0 : i32
    return %arg1, %arg0, %c0_i32 : i32, i32, i32
  }
  func.func @transform_7(%arg0: i32, %arg1: i32) -> (i32, i32) {
    %c0_i32 = arith.constant 0 : i32
    %c0_i32_0 = arith.constant 0 : i32
    return %arg0, %c0_i32 : i32, i32
  }
}

</mosaic_0001>

<bundles_post_ra>
// kernel: tpu_custom_call.1
= control target key start
LH: loop header
LB: loop body
LE: loop exit
PB: predicated region body
PF: predicated region fallthrough
CT: control target
= control target key end

     0   :  { %13 = vsyncpa [#allocation5], 0  ;;  %s5688_s0 = inlined_call_operand.hbm [shape: f32[8,8,128], index: 0, kind: input, shape index: {}]   ;;  %s5689_s1 = inlined_call_operand.hbm [shape: f32[8,128], index: 1, kind: input, shape index: {}]   ;;  %s5690_s2 = inlined_call_operand.hbm [shape: f32[128,384], index: 2, kind: input, shape index: {}]   ;;  %s5691_s3 = inlined_call_operand.hbm [shape: f32[128,384], index: 3, kind: input, shape index: {}]   ;;  %s5692_s4 = inlined_call_operand.vmem [shape: f32[1,384], index: 4, kind: input, shape index: {}]   ;;  %s5693_s5 = inlined_call_operand.vmem [shape: f32[1,128], index: 5, kind: input, shape index: {}]   ;;  %s5694_s6 = inlined_call_operand.hbm [shape: f32[8,8,128], index: 6, kind: output, shape index: {0}]   ;;  %s5695_s7 = inlined_call_operand.hbm [shape: f32[8,128], index: 7, kind: output, shape index: {1}]  }
   0x1   :  { %14 = vsyncpa [#allocation8], 0 }
   0x2   :  { %15 = vsyncpa [#allocation11], 0 }
   0x3   :  { %16 = vsyncpa [#allocation6], 0 }
   0x4   :  { %17 = vsyncpa [#allocation14], 0  ;;  %s4789_s24 = smov [#allocation7]   ;;  %s4790_s26 = smov [#allocation4]  }
   0x5   :  { %s36_s25 = sshll.u32 %s4789_s24, 4  ;;  %s23_s27 = sshll.u32 %s4790_s26, 4  ;;  %s37_s25 = int_to_ptr.vmem [resolvable:$true] %s36_s25  ;;  %s4842_s27 = int_to_ptr.vmem [resolvable:$true] %s23_s27 }
   0x6   :  { %s4647_s30 = scalar_lea.hbm %s5689_s1, 128 }
   0x7   :  { %p4648_p0 = scmp.ne.s32.totalorder %s5689_s1, %s4647_s30  ;;  %p4651_p1 = scmp.lt.u32.totalorder %s4647_s30, %s5689_s1 }
   0x9   :  { %p4653_p2 = pnand %p4651_p1, %p4648_p0 }
   0xb   :  { %4656 = shalt.err (!%p4653_p2)
}
   0xc   :  { %s4657_s12 = scalar_lea.vmem %s37_s25, 128  ;;  %p4662_p4 = scmp.lt.s32.totalorder %s37_s25, %s37_s25 }
   0xd   :  { %p4658_p3 = scmp.ne.s32.totalorder %s37_s25, %s4657_s12  ;;  %p4663_p5 = scmp.lt.s32.totalorder %s4657_s12, %s4657_s12 }
   0xf   :  { %p4664_p6 = por %p4663_p5, %p4662_p4 }
  0x11   :  { %p4665_p7 = pnand %p4664_p6, %p4658_p3 }
  0x13   :  { %4668 = shalt.err (!%p4665_p7)
}
  0x14   :  { %39 = dma.hbm_to_vmem [thread:$0]  %s5689_s1, 128, %s37_s25, [#allocation8]  }
  0x15   :  { %s4669_s17 = scalar_lea.hbm %s5688_s0, 1024 }
  0x16   :  { %p4670_p8 = scmp.ne.s32.totalorder %s5688_s0, %s4669_s17  ;;  %p4673_p9 = scmp.lt.u32.totalorder %s4669_s17, %s5688_s0 }
  0x18   :  { %p4675_p10 = pnand %p4673_p9, %p4670_p8 }
  0x1a   :  { %4678 = shalt.err (!%p4675_p10)
}
  0x1b   :  { %s4679_s22 = scalar_lea.vmem %s4842_s27, 1024  ;;  %p4684_p12 = scmp.lt.s32.totalorder %s4842_s27, %s4842_s27 }
  0x1c   :  { %p4680_p11 = scmp.ne.s32.totalorder %s4842_s27, %s4679_s22  ;;  %p4685_p13 = scmp.lt.s32.totalorder %s4679_s22, %s4679_s22 }
  0x1e   :  { %p4686_p0 = por %p4685_p13, %p4684_p12 }
  0x20   :  { %p4687_p1 = pnand %p4686_p0, %p4680_p11 }
  0x22   :  { %4690 = shalt.err (!%p4687_p1)
}
  0x23   :  { %s4791_s1 = smov 128   ;;  %s4792_s23 = smov 8  }
  0x24   :  { %29 = dma.hbm_to_vmem [thread:$0]  %s5688_s0, 1024, %s4842_s27, [#allocation5], %s4791_s1, %s4791_s1, %s4792_s23  }
  0x25   :  { %s4793_s26 = smov [#allocation9]   ;;  %s4691_s8 = scalar_lea.hbm %s5690_s2, 6144 }
  0x26   :  { %s45_s28 = sshll.u32 %s4793_s26, 4  ;;  %p4692_p2 = scmp.ne.s32.totalorder %s5690_s2, %s4691_s8  ;;  %s46_s28 = int_to_ptr.vmem [resolvable:$true] %s45_s28 }
  0x27   :  { %p4695_p3 = scmp.lt.u32.totalorder %s4691_s8, %s5690_s2 }
  0x29   :  { %p4697_p4 = pnand %p4695_p3, %p4692_p2 }
  0x2b   :  { %4700 = shalt.err (!%p4697_p4)
}
  0x2c   :  { %s4701_s13 = scalar_lea.vmem %s46_s28, 6144  ;;  %p4706_p6 = scmp.lt.s32.totalorder %s46_s28, %s46_s28 }
  0x2d   :  { %p4702_p5 = scmp.ne.s32.totalorder %s46_s28, %s4701_s13  ;;  %p4707_p7 = scmp.lt.s32.totalorder %s4701_s13, %s4701_s13 }
  0x2f   :  { %p4708_p8 = por %p4707_p7, %p4706_p6 }
  0x31   :  { %p4709_p9 = pnand %p4708_p8, %p4702_p5 }
  0x33   :  { %4712 = shalt.err (!%p4709_p9)
}
  0x34   :  { %s4794_s0 = smov 384   ;;  %s4795_s27 = smov 24  }
  0x35   :  { %51 = dma.hbm_to_vmem [thread:$0]  %s5690_s2, 6144, %s46_s28, [#allocation8], %s4794_s0, %s4794_s0, %s4795_s27  }
  0x36   :  { %s4796_s16 = smov [#allocation10]   ;;  %s4713_s20 = scalar_lea.hbm %s5691_s3, 6144 }
  0x37   :  { %s57_s17 = sshll.u32 %s4796_s16, 4  ;;  %p4714_p10 = scmp.ne.s32.totalorder %s5691_s3, %s4713_s20  ;;  %s58_s17 = int_to_ptr.vmem [resolvable:$true] %s57_s17 }
  0x38   :  { %p4717_p11 = scmp.lt.u32.totalorder %s4713_s20, %s5691_s3 }
  0x3a   :  { %p4719_p12 = pnand %p4717_p11, %p4714_p10 }
  0x3c   :  { %4722 = shalt.err (!%p4719_p12)
}
  0x3d   :  { %s4723_s26 = scalar_lea.vmem %s58_s17, 6144  ;;  %p4728_p0 = scmp.lt.s32.totalorder %s58_s17, %s58_s17 }
  0x3e   :  { %p4724_p13 = scmp.ne.s32.totalorder %s58_s17, %s4723_s26  ;;  %p4729_p1 = scmp.lt.s32.totalorder %s4723_s26, %s4723_s26 }
  0x40   :  { %p4730_p2 = por %p4729_p1, %p4728_p0 }
  0x42   :  { %p4731_p3 = pnand %p4730_p2, %p4724_p13 }
  0x44   :  { %4734 = shalt.err (!%p4731_p3)
}
  0x45   :  { %63 = dma.hbm_to_vmem [thread:$0]  %s5691_s3, 6144, %s58_s17, [#allocation11], %s4794_s0, %s4794_s0, %s4795_s27  }
  0x46   :  { %4779 = dma.done.wait [#allocation5], 1024  }
  0x47   :  { %4780 = vsyncadd [#allocation5], 4294966272 }
  0x48   :  { %4781 = dma.done.wait [#allocation8], 6272  }
  0x49   :  { %4782 = vsyncadd [#allocation8], 4294961024 }
  0x4a   :  { %4783 = dma.done.wait [#allocation11], 6144  }
  0x4b   :  { %4784 = vsyncadd [#allocation11], 4294961152  ;;  %v4797_v0 = vmov 0.0|0.0   ;;  %v4798_v1 = vmov 0.0   ;;  %vm4799_vm0 = vmmov 0   ;;  %v87_v2 = vld [vmem:[#allocation9 + $0x8] sm:$0xff] }
  0x4c   :  { %3658 = vmatprep.subr.bf16.mxu1 %v4797_v0  ;;  %271 = vmatprep.mubr.f32.mxu0 %v4798_v1  ;;  %v90_v3 = vld [vmem:[#allocation9 + $0x20] sm:$0xff]  ;;  %v89_v6 = vld [vmem:[#allocation9 + $0x18] sm:$0xff]  ;;  %v96_v8 = vld [vmem:[#allocation9 + $0x50] sm:$0xff]  ;;  %s4801_s9 = smov [#allocation13]  }
  0x4d   :  { %3098 = vmatprep.mubr.msk.f32.mxu1 %vm4799_vm0, %v4798_v1  ;;  %v86_v4 = vld [vmem:[#allocation9] sm:$0xff]  ;;  %v4904_v5 = vpack.c.bf16 %v90_v3, %v87_v2  ;;  %v93_v7 = vld [vmem:[#allocation9 + $0x38] sm:$0xff]  ;;  %v92_v11 = vld [vmem:[#allocation9 + $0x30] sm:$0xff]  ;;  %s2762_s10 = sshll.u32 %s4801_s9, 4  ;;  %s2763_s10 = int_to_ptr.vmem [resolvable:$true] %s2762_s10 }
  0x4e   :  { %v4906_v9 = vpack.c.bf16 %v89_v6, %v86_v4  ;;  %v4908_v10 = vpack.c.bf16 %v96_v8, %v93_v7  ;;  %v95_v12 = vld [vmem:[#allocation9 + $0x48] sm:$0xff]  ;;  %v102_v14 = vld [vmem:[#allocation9 + $0x80] sm:$0xff]  ;;  %v101_v18 = vld [vmem:[#allocation9 + $0x78] sm:$0xff] }
  0x4f   :  { %v99_v13 = vld [vmem:[#allocation9 + $0x68] sm:$0xff]  ;;  %3627 = vmatprep.subr.bf16.mxu0 %v4904_v5  ;;  %v4912_v15 = vpack.c.bf16 %v95_v12, %v92_v11  ;;  %v98_v17 = vld [vmem:[#allocation9 + $0x60] sm:$0xff]  ;;  %v105_v19 = vld [vmem:[#allocation9 + $0x98] sm:$0xff] }
  0x50   :  { %3629 = vmatpush1.bf16.msra.mxu0 %v4906_v9  ;;  %v4915_v16 = vpack.c.bf16 %v102_v14, %v99_v13  ;;  %v108_v20 = vld [vmem:[#allocation9 + $0xb0] sm:$0xff]  ;;  %v4918_v21 = vpack.c.bf16 %v101_v18, %v98_v17  ;;  %v107_v24 = vld [vmem:[#allocation9 + $0xa8] sm:$0xff]  ;;  %v114_v28 = vld [vmem:[#allocation9 + $0xe0] sm:$0xff] }
  0x51   :  { %3631 = vmatprep.subr.bf16.mxu0 %v4908_v10  ;;  %v104_v22 = vld [vmem:[#allocation9 + $0x90] sm:$0xff]  ;;  %v4921_v23 = vpack.c.bf16 %v108_v20, %v105_v19  ;;  %v91_v26 = vld [vmem:[#allocation9 + $0x28] sm:$0xff]  ;;  %v94_v30 = vld [vmem:[#allocation9 + $0x40] sm:$0xff] }
  0x52   :  { %v88_v25 = vld [vmem:[#allocation9 + $0x10] sm:$0xff]  ;;  %v111_v27 = vld [vmem:[#allocation9 + $0xc8] sm:$0xff]  ;;  %v97_v31 = vld [vmem:[#allocation9 + $0x58] sm:$0xff]  ;;  %v4926_v32 = vpack.c.bf16 %v107_v24, %v104_v22 }
  0x53   :  { %v4923_v29 = vpack.c.bf16 %v91_v26, %v88_v25  ;;  %v110_v33 = vld [vmem:[#allocation9 + $0xc0] sm:$0xff]  ;;  %v4929_v34 = vpack.c.bf16 %v97_v31, %v94_v30  ;;  %v4932_v35 = vpack.c.bf16 %v114_v28, %v111_v27  ;;  %v113_v36 = vld [vmem:[#allocation9 + $0xd8] sm:$0xff]  ;;  %v100_v37 = vld [vmem:[#allocation9 + $0x70] sm:$0xff] }
  0x54   :  { %3633 = vmatpush1.bf16.msra.mxu0 %v4912_v15  ;;  %v103_v38 = vld [vmem:[#allocation9 + $0x88] sm:$0xff]  ;;  %v117_v39 = vld [vmem:[#allocation9 + $0xf8] sm:$0xff]  ;;  %v120_v40 = vld [vmem:[#allocation9 + $0x110] sm:$0xff]  ;;  %v4936_v41 = vpack.c.bf16 %v113_v36, %v110_v33 }
  0x55   :  { %3635 = vmatprep.subr.bf16.mxu0 %v4915_v16  ;;  %3660 = vmatpush3.bf16.msra.mxu1 %v4923_v29  ;;  %v116_v42 = vld [vmem:[#allocation9 + $0xf0] sm:$0xff]  ;;  %v4939_v43 = vpack.c.bf16 %v103_v38, %v100_v37  ;;  %v4942_v44 = vpack.c.bf16 %v120_v40, %v117_v39  ;;  %v119_v45 = vld [vmem:[#allocation9 + $0x108] sm:$0xff]  ;;  %v106_v46 = vld [vmem:[#allocation9 + $0xa0] sm:$0xff] }
  0x56   :  { %3661 = vmatprep.subr.bf16.mxu1 %v4797_v0  ;;  %v109_v47 = vld [vmem:[#allocation9 + $0xb8] sm:$0xff]  ;;  %v123_v48 = vld [vmem:[#allocation9 + $0x128] sm:$0xff]  ;;  %v126_v49 = vld [vmem:[#allocation9 + $0x140] sm:$0xff]  ;;  %v4946_v50 = vpack.c.bf16 %v119_v45, %v116_v42 }
  0x57   :  { %v122_v51 = vld [vmem:[#allocation9 + $0x120] sm:$0xff]  ;;  %v4949_v52 = vpack.c.bf16 %v109_v47, %v106_v46  ;;  %v4952_v53 = vpack.c.bf16 %v126_v49, %v123_v48  ;;  %v125_v54 = vld [vmem:[#allocation9 + $0x138] sm:$0xff]  ;;  %v112_v55 = vld [vmem:[#allocation9 + $0xd0] sm:$0xff] }
  0x58   :  { %3637 = vmatpush1.bf16.msra.mxu0 %v4918_v21  ;;  %v115_v56 = vld [vmem:[#allocation9 + $0xe8] sm:$0xff]  ;;  %v129_v57 = vld [vmem:[#allocation9 + $0x158] sm:$0xff]  ;;  %v132_v58 = vld [vmem:[#allocation9 + $0x170] sm:$0xff]  ;;  %v4956_v59 = vpack.c.bf16 %v125_v54, %v122_v51 }
  0x59   :  { %3639 = vmatprep.subr.bf16.mxu0 %v4921_v23  ;;  %3663 = vmatpush3.bf16.msra.mxu1 %v4929_v34  ;;  %v128_v60 = vld [vmem:[#allocation9 + $0x150] sm:$0xff]  ;;  %v4959_v61 = vpack.c.bf16 %v115_v56, %v112_v55  ;;  %v4962_v62 = vpack.c.bf16 %v132_v58, %v129_v57  ;;  %v131_v63 = vld [vmem:[#allocation9 + $0x168] sm:$0xff]  ;;  %v118_v2 = vld [vmem:[#allocation9 + $0x100] sm:$0xff] }
  0x5a   :  { %3664 = vmatprep.subr.bf16.mxu1 %v4797_v0  ;;  %v121_v3 = vld [vmem:[#allocation9 + $0x118] sm:$0xff]  ;;  %v4966_v4 = vpack.c.bf16 %v131_v63, %v128_v60  ;;  %v124_v7 = vld [vmem:[#allocation9 + $0x130] sm:$0xff]  ;;  %v127_v8 = vld [vmem:[#allocation9 + $0x148] sm:$0xff] }
  0x5b   :  { %v4969_v6 = vpack.c.bf16 %v121_v3, %v118_v2  ;;  %v206_v11 = vld [vmem:[#allocation4] sm:$0xff]  ;;  %v4975_v12 = vpack.c.bf16 %v127_v8, %v124_v7  ;;  %v130_v13 = vld [vmem:[#allocation9 + $0x160] sm:$0xff]  ;;  %v499_v19 = vld [vmem:[#allocation4 + $0x10] sm:$0xff] }
  0x5c   :  { %3641 = vmatpush1.bf16.msra.mxu0 %v4926_v32  ;;  %v133_v14 = vld [vmem:[#allocation9 + $0x178] sm:$0xff]  ;;  %v352_v18 = vld [vmem:[#allocation4 + $0x8] sm:$0xff]  ;;  %v646_v20 = vld [vmem:[#allocation4 + $0x18] sm:$0xff] }
  0x5d   :  { %3643 = vmatprep.subr.bf16.mxu0 %v4932_v35  ;;  %3666 = vmatpush3.bf16.msra.mxu1 %v4939_v43  ;;  %v4981_v17 = vpack.c.bf16 %v133_v14, %v130_v13  ;;  %v793_v22 = vld [vmem:[#allocation4 + $0x20] sm:$0xff]  ;;  %v940_v24 = vld [vmem:[#allocation4 + $0x28] sm:$0xff]  ;;  %v1087_v25 = vld [vmem:[#allocation4 + $0x30] sm:$0xff] }
  0x5e   :  { %3667 = vmatprep.subr.bf16.mxu1 %v4797_v0  ;;  %v1234_v28 = vld [vmem:[#allocation4 + $0x38] sm:$0xff]  ;;  %v147_v33 = vld [vmem:[#allocation10 + $0x68] sm:$0xff]  ;;  %v146_v36 = vld [vmem:[#allocation10 + $0x60] sm:$0xff] }
  0x5f   :  { %v140_v31 = vld [vmem:[#allocation10 + $0x30] sm:$0xff]  ;;  %v149_v38 = vld [vmem:[#allocation10 + $0x78] sm:$0xff]  ;;  %v139_v40 = vld [vmem:[#allocation10 + $0x28] sm:$0xff] }
  0x60   :  { %3645 = vmatpush1.bf16.msra.mxu0 %v4936_v41  ;;  %v136_v39 = vld [vmem:[#allocation10 + $0x10] sm:$0xff]  ;;  %v155_v47 = vld [vmem:[#allocation10 + $0xa8] sm:$0xff]  ;;  %v142_v48 = vld [vmem:[#allocation10 + $0x40] sm:$0xff] }
  0x61   :  { %3647 = vmatprep.subr.bf16.mxu0 %v4942_v44  ;;  %3669 = vmatpush3.bf16.msra.mxu1 %v4949_v52  ;;  %v156_v42 = vld [vmem:[#allocation10 + $0xb0] sm:$0xff]  ;;  %v5247_v45 = vpack.c.bf16 %v139_v40, %v136_v39  ;;  %v145_v49 = vld [vmem:[#allocation10 + $0x58] sm:$0xff]  ;;  %v162_v51 = vld [vmem:[#allocation10 + $0xe0] sm:$0xff] }
  0x62   :  { %3670 = vmatprep.subr.bf16.mxu1 %v4797_v0  ;;  %v5257_v54 = vpack.c.bf16 %v145_v49, %v142_v48  ;;  %v161_v56 = vld [vmem:[#allocation10 + $0xd8] sm:$0xff]  ;;  %v148_v57 = vld [vmem:[#allocation10 + $0x70] sm:$0xff]  ;;  %v151_v58 = vld [vmem:[#allocation10 + $0x88] sm:$0xff] }
  0x63   :  { %v168_v60 = vld [vmem:[#allocation10 + $0x110] sm:$0xff]  ;;  %v5269_v63 = vpack.c.bf16 %v151_v58, %v148_v57  ;;  %v167_v3 = vld [vmem:[#allocation10 + $0x108] sm:$0xff]  ;;  %v174_v8 = vld [vmem:[#allocation10 + $0x140] sm:$0xff] }
  0x64   :  { %3649 = vmatpush1.bf16.msra.mxu0 %v4946_v50  ;;  %v171_v7 = vld [vmem:[#allocation10 + $0x128] sm:$0xff]  ;;  %v181_v39 = vld [vmem:[#allocation10 + $0x178] sm:$0xff] }
  0x65   :  { %3651 = vmatprep.subr.bf16.mxu0 %v4952_v53  ;;  %3672 = vmatpush3.bf16.msra.mxu1 %v4959_v61  ;;  %v5282_v14 = vpack.c.bf16 %v174_v8, %v171_v7 }
  0x66   :  { %3673 = vmatprep.subr.bf16.mxu1 %v4797_v0 }
  0x68   :  { %3653 = vmatpush1.bf16.msra.mxu0 %v4956_v59 }
  0x69   :  { %3655 = vmatprep.subr.bf16.mxu0 %v4962_v62  ;;  %3675 = vmatpush3.bf16.msra.mxu1 %v4969_v6 }
  0x6a   :  { %3676 = vmatprep.subr.bf16.mxu1 %v4797_v0 }
  0x6c   :  { %3657 = vmatpush1.bf16.msra.mxu0 %v4966_v4 }
  0x6d   :  { %3683 = vmatprep.subr.bf16.mxu0 %v4904_v5  ;;  %3678 = vmatpush3.bf16.msra.mxu1 %v4975_v12 }
  0x6e   :  { %3679 = vmatprep.subr.bf16.mxu1 %v4797_v0 }
  0x6f   :  { %272 = vmatmul.mubr.f32.vlgmr.msra.gmra.mrb[0].mxu0 %v206_v11 }
  0x70   :  { %3685 = vmatpush1.bf16.msra.mxu0 %v4906_v9  ;;  %417 = vmatprep.mubr.f32.mxu0 %v4798_v1 }
  0x71   :  { %3687 = vmatprep.subr.bf16.mxu0 %v4908_v10  ;;  %3681 = vmatpush3.bf16.msra.mxu1 %v4981_v17 }
  0x72   :  { %3714 = vmatprep.subr.bf16.mxu1 %v4797_v0 }
  0x74   :  { %3689 = vmatpush1.bf16.msra.mxu0 %v4912_v15  ;;  %3099 = vmatmul.mubr.f32.vlgmr.msra.gmra.mrb[0].mxu1 %v206_v11 }
  0x75   :  { %3691 = vmatprep.subr.bf16.mxu0 %v4915_v16  ;;  %3716 = vmatpush3.bf16.msra.mxu1 %v4923_v29 }
  0x76   :  { %3717 = vmatprep.subr.bf16.mxu1 %v4797_v0  ;;  %3133 = vmatprep.mubr.msk.f32.mxu1 %vm4799_vm0, %v4798_v1 }
  0x78   :  { %3693 = vmatpush1.bf16.msra.mxu0 %v4918_v21 }
  0x79   :  { %3695 = vmatprep.subr.bf16.mxu0 %v4921_v23  ;;  %3719 = vmatpush3.bf16.msra.mxu1 %v4929_v34 }
  0x7a   :  { %3720 = vmatprep.subr.bf16.mxu1 %v4797_v0 }
  0x7c   :  { %3697 = vmatpush1.bf16.msra.mxu0 %v4926_v32 }
  0x7d   :  { %3699 = vmatprep.subr.bf16.mxu0 %v4932_v35  ;;  %3722 = vmatpush3.bf16.msra.mxu1 %v4939_v43 }
  0x7e   :  { %3723 = vmatprep.subr.bf16.mxu1 %v4797_v0 }
  0x80   :  { %3701 = vmatpush1.bf16.msra.mxu0 %v4936_v41 }
  0x81   :  { %3703 = vmatprep.subr.bf16.mxu0 %v4942_v44  ;;  %3725 = vmatpush3.bf16.msra.mxu1 %v4949_v52 }
  0x82   :  { %3726 = vmatprep.subr.bf16.mxu1 %v4797_v0 }
  0x84   :  { %3705 = vmatpush1.bf16.msra.mxu0 %v4946_v50 }
  0x85   :  { %3707 = vmatprep.subr.bf16.mxu0 %v4952_v53  ;;  %3728 = vmatpush3.bf16.msra.mxu1 %v4959_v61 }
  0x86   :  { %3729 = vmatprep.subr.bf16.mxu1 %v4797_v0 }
  0x88   :  { %3709 = vmatpush1.bf16.msra.mxu0 %v4956_v59 }
  0x89   :  { %3711 = vmatprep.subr.bf16.mxu0 %v4962_v62  ;;  %3731 = vmatpush3.bf16.msra.mxu1 %v4969_v6 }
  0x8a   :  { %3732 = vmatprep.subr.bf16.mxu1 %v4797_v0 }
  0x8c   :  { %3713 = vmatpush1.bf16.msra.mxu0 %v4966_v4 }
  0x8d   :  { %3739 = vmatprep.subr.bf16.mxu0 %v4904_v5  ;;  %3734 = vmatpush3.bf16.msra.mxu1 %v4975_v12 }
  0x8e   :  { %3735 = vmatprep.subr.bf16.mxu1 %v4797_v0 }
  0x8f   :  { %418 = vmatmul.mubr.f32.vlgmr.msra.gmra.mrb[2].mxu0 %v352_v18 }
  0x90   :  { %3741 = vmatpush1.bf16.msra.mxu0 %v4906_v9  ;;  %564 = vmatprep.mubr.f32.mxu0 %v4798_v1 }
  0x91   :  { %3743 = vmatprep.subr.bf16.mxu0 %v4908_v10  ;;  %3737 = vmatpush3.bf16.msra.mxu1 %v4981_v17 }
  0x92   :  { %3770 = vmatprep.subr.bf16.mxu1 %v4797_v0 }
  0x94   :  { %3745 = vmatpush1.bf16.msra.mxu0 %v4912_v15  ;;  %3134 = vmatmul.mubr.f32.vlgmr.msra.gmra.mrb[2].mxu1 %v352_v18  ;;  %v160_v18 = vld [vmem:[#allocation10 + $0xd0] sm:$0xff] }
  0x95   :  { %3747 = vmatprep.subr.bf16.mxu0 %v4915_v16  ;;  %3772 = vmatpush3.bf16.msra.mxu1 %v4923_v29 }
  0x96   :  { %3773 = vmatprep.subr.bf16.mxu1 %v4797_v0  ;;  %3168 = vmatprep.mubr.msk.f32.mxu1 %vm4799_vm0, %v4798_v1 }
  0x98   :  { %3749 = vmatpush1.bf16.msra.mxu0 %v4918_v21 }
  0x99   :  { %3751 = vmatprep.subr.bf16.mxu0 %v4921_v23  ;;  %3775 = vmatpush3.bf16.msra.mxu1 %v4929_v34 }
  0x9a   :  { %3776 = vmatprep.subr.bf16.mxu1 %v4797_v0 }
  0x9c   :  { %3753 = vmatpush1.bf16.msra.mxu0 %v4926_v32 }
  0x9d   :  { %3755 = vmatprep.subr.bf16.mxu0 %v4932_v35  ;;  %3778 = vmatpush3.bf16.msra.mxu1 %v4939_v43 }
  0x9e   :  { %3779 = vmatprep.subr.bf16.mxu1 %v4797_v0 }
  0xa0   :  { %3757 = vmatpush1.bf16.msra.mxu0 %v4936_v41 }
  0xa1   :  { %3759 = vmatprep.subr.bf16.mxu0 %v4942_v44  ;;  %3781 = vmatpush3.bf16.msra.mxu1 %v4949_v52 }
  0xa2   :  { %3782 = vmatprep.subr.bf16.mxu1 %v4797_v0 }
  0xa4   :  { %3761 = vmatpush1.bf16.msra.mxu0 %v4946_v50 }
  0xa5   :  { %3763 = vmatprep.subr.bf16.mxu0 %v4952_v53  ;;  %3784 = vmatpush3.bf16.msra.mxu1 %v4959_v61 }
  0xa6   :  { %3785 = vmatprep.subr.bf16.mxu1 %v4797_v0 }
  0xa8   :  { %3765 = vmatpush1.bf16.msra.mxu0 %v4956_v59 }
  0xa9   :  { %3767 = vmatprep.subr.bf16.mxu0 %v4962_v62  ;;  %3787 = vmatpush3.bf16.msra.mxu1 %v4969_v6 }
  0xaa   :  { %3788 = vmatprep.subr.bf16.mxu1 %v4797_v0 }
  0xac   :  { %3769 = vmatpush1.bf16.msra.mxu0 %v4966_v4 }
  0xad   :  { %3795 = vmatprep.subr.bf16.mxu0 %v4904_v5  ;;  %3790 = vmatpush3.bf16.msra.mxu1 %v4975_v12 }
  0xae   :  { %3791 = vmatprep.subr.bf16.mxu1 %v4797_v0 }
  0xaf   :  { %565 = vmatmul.mubr.f32.vlgmr.msra.gmra.mrb[4].mxu0 %v499_v19 }
  0xb0   :  { %3797 = vmatpush1.bf16.msra.mxu0 %v4906_v9  ;;  %711 = vmatprep.mubr.f32.mxu0 %v4798_v1 }
  0xb1   :  { %3799 = vmatprep.subr.bf16.mxu0 %v4908_v10  ;;  %3793 = vmatpush3.bf16.msra.mxu1 %v4981_v17 }
  0xb2   :  { %3826 = vmatprep.subr.bf16.mxu1 %v4797_v0 }
  0xb4   :  { %3801 = vmatpush1.bf16.msra.mxu0 %v4912_v15  ;;  %3169 = vmatmul.mubr.f32.vlgmr.msra.gmra.mrb[4].mxu1 %v499_v19  ;;  %v163_v19 = vld [vmem:[#allocation10 + $0xe8] sm:$0xff] }
  0xb5   :  { %3803 = vmatprep.subr.bf16.mxu0 %v4915_v16  ;;  %3828 = vmatpush3.bf16.msra.mxu1 %v4923_v29 }
  0xb6   :  { %3829 = vmatprep.subr.bf16.mxu1 %v4797_v0  ;;  %3203 = vmatprep.mubr.msk.f32.mxu1 %vm4799_vm0, %v4798_v1 }
  0xb8   :  { %3805 = vmatpush1.bf16.msra.mxu0 %v4918_v21 }
  0xb9   :  { %3807 = vmatprep.subr.bf16.mxu0 %v4921_v23  ;;  %3831 = vmatpush3.bf16.msra.mxu1 %v4929_v34 }
  0xba   :  { %3832 = vmatprep.subr.bf16.mxu1 %v4797_v0 }
  0xbc   :  { %3809 = vmatpush1.bf16.msra.mxu0 %v4926_v32 }
  0xbd   :  { %3811 = vmatprep.subr.bf16.mxu0 %v4932_v35  ;;  %3834 = vmatpush3.bf16.msra.mxu1 %v4939_v43 }
  0xbe   :  { %3835 = vmatprep.subr.bf16.mxu1 %v4797_v0 }
  0xc0   :  { %3813 = vmatpush1.bf16.msra.mxu0 %v4936_v41 }
  0xc1   :  { %3815 = vmatprep.subr.bf16.mxu0 %v4942_v44  ;;  %3837 = vmatpush3.bf16.msra.mxu1 %v4949_v52 }
  0xc2   :  { %3838 = vmatprep.subr.bf16.mxu1 %v4797_v0 }
  0xc4   :  { %3817 = vmatpush1.bf16.msra.mxu0 %v4946_v50 }
  0xc5   :  { %3819 = vmatprep.subr.bf16.mxu0 %v4952_v53  ;;  %3840 = vmatpush3.bf16.msra.mxu1 %v4959_v61 }
  0xc6   :  { %3841 = vmatprep.subr.bf16.mxu1 %v4797_v0 }
  0xc8   :  { %3821 = vmatpush1.bf16.msra.mxu0 %v4956_v59 }
  0xc9   :  { %3823 = vmatprep.subr.bf16.mxu0 %v4962_v62  ;;  %3843 = vmatpush3.bf16.msra.mxu1 %v4969_v6 }
  0xca   :  { %3844 = vmatprep.subr.bf16.mxu1 %v4797_v0 }
  0xcc   :  { %3825 = vmatpush1.bf16.msra.mxu0 %v4966_v4 }
  0xcd   :  { %3851 = vmatprep.subr.bf16.mxu0 %v4904_v5  ;;  %3846 = vmatpush3.bf16.msra.mxu1 %v4975_v12 }
  0xce   :  { %3847 = vmatprep.subr.bf16.mxu1 %v4797_v0 }
  0xcf   :  { %712 = vmatmul.mubr.f32.vlgmr.msra.gmra.mrb[6].mxu0 %v646_v20 }
  0xd0   :  { %3853 = vmatpush1.bf16.msra.mxu0 %v4906_v9  ;;  %858 = vmatprep.mubr.f32.mxu0 %v4798_v1 }
  0xd1   :  { %3855 = vmatprep.subr.bf16.mxu0 %v4908_v10  ;;  %3849 = vmatpush3.bf16.msra.mxu1 %v4981_v17 }
  0xd2   :  { %3882 = vmatprep.subr.bf16.mxu1 %v4797_v0 }
  0xd4   :  { %3857 = vmatpush1.bf16.msra.mxu0 %v4912_v15  ;;  %3204 = vmatmul.mubr.f32.vlgmr.msra.gmra.mrb[6].mxu1 %v646_v20  ;;  %v177_v20 = vld [vmem:[#allocation10 + $0x158] sm:$0xff] }
  0xd5   :  { %3859 = vmatprep.subr.bf16.mxu0 %v4915_v16  ;;  %3884 = vmatpush3.bf16.msra.mxu1 %v4923_v29 }
  0xd6   :  { %3885 = vmatprep.subr.bf16.mxu1 %v4797_v0  ;;  %3238 = vmatprep.mubr.msk.f32.mxu1 %vm4799_vm0, %v4798_v1 }
  0xd8   :  { %3861 = vmatpush1.bf16.msra.mxu0 %v4918_v21 }
  0xd9   :  { %3863 = vmatprep.subr.bf16.mxu0 %v4921_v23  ;;  %3887 = vmatpush3.bf16.msra.mxu1 %v4929_v34 }
  0xda   :  { %3888 = vmatprep.subr.bf16.mxu1 %v4797_v0 }
  0xdc   :  { %3865 = vmatpush1.bf16.msra.mxu0 %v4926_v32 }
  0xdd   :  { %3867 = vmatprep.subr.bf16.mxu0 %v4932_v35  ;;  %3890 = vmatpush3.bf16.msra.mxu1 %v4939_v43 }
  0xde   :  { %3891 = vmatprep.subr.bf16.mxu1 %v4797_v0 }
  0xe0   :  { %3869 = vmatpush1.bf16.msra.mxu0 %v4936_v41 }
  0xe1   :  { %3871 = vmatprep.subr.bf16.mxu0 %v4942_v44  ;;  %3893 = vmatpush3.bf16.msra.mxu1 %v4949_v52 }
  0xe2   :  { %3894 = vmatprep.subr.bf16.mxu1 %v4797_v0 }
  0xe4   :  { %3873 = vmatpush1.bf16.msra.mxu0 %v4946_v50 }
  0xe5   :  { %3875 = vmatprep.subr.bf16.mxu0 %v4952_v53  ;;  %3896 = vmatpush3.bf16.msra.mxu1 %v4959_v61 }
  0xe6   :  { %3897 = vmatprep.subr.bf16.mxu1 %v4797_v0 }
  0xe8   :  { %3877 = vmatpush1.bf16.msra.mxu0 %v4956_v59 }
  0xe9   :  { %3879 = vmatprep.subr.bf16.mxu0 %v4962_v62  ;;  %3899 = vmatpush3.bf16.msra.mxu1 %v4969_v6 }
  0xea   :  { %3900 = vmatprep.subr.bf16.mxu1 %v4797_v0 }
  0xec   :  { %3881 = vmatpush1.bf16.msra.mxu0 %v4966_v4 }
  0xed   :  { %3907 = vmatprep.subr.bf16.mxu0 %v4904_v5  ;;  %3902 = vmatpush3.bf16.msra.mxu1 %v4975_v12 }
  0xee   :  { %3903 = vmatprep.subr.bf16.mxu1 %v4797_v0 }
  0xef   :  { %859 = vmatmul.mubr.f32.vlgmr.msra.gmra.mrb[8].mxu0 %v793_v22 }
  0xf0   :  { %3909 = vmatpush1.bf16.msra.mxu0 %v4906_v9  ;;  %1005 = vmatprep.mubr.f32.mxu0 %v4798_v1 }
  0xf1   :  { %3911 = vmatprep.subr.bf16.mxu0 %v4908_v10  ;;  %3905 = vmatpush3.bf16.msra.mxu1 %v4981_v17 }
  0xf2   :  { %3938 = vmatprep.subr.bf16.mxu1 %v4797_v0 }
  0xf4   :  { %3913 = vmatpush1.bf16.msra.mxu0 %v4912_v15  ;;  %3239 = vmatmul.mubr.f32.vlgmr.msra.gmra.mrb[8].mxu1 %v793_v22  ;;  %v180_v22 = vld [vmem:[#allocation10 + $0x170] sm:$0xff] }
  0xf5   :  { %3915 = vmatprep.subr.bf16.mxu0 %v4915_v16  ;;  %3940 = vmatpush3.bf16.msra.mxu1 %v4923_v29 }
  0xf6   :  { %3941 = vmatprep.subr.bf16.mxu1 %v4797_v0  ;;  %3273 = vmatprep.mubr.msk.f32.mxu1 %vm4799_vm0, %v4798_v1 }
  0xf8   :  { %3917 = vmatpush1.bf16.msra.mxu0 %v4918_v21 }
  0xf9   :  { %3919 = vmatprep.subr.bf16.mxu0 %v4921_v23  ;;  %3943 = vmatpush3.bf16.msra.mxu1 %v4929_v34 }
  0xfa   :  { %3944 = vmatprep.subr.bf16.mxu1 %v4797_v0 }
  0xfc   :  { %3921 = vmatpush1.bf16.msra.mxu0 %v4926_v32 }
  0xfd   :  { %3923 = vmatprep.subr.bf16.mxu0 %v4932_v35  ;;  %3946 = vmatpush3.bf16.msra.mxu1 %v4939_v43 }
  0xfe   :  { %3947 = vmatprep.subr.bf16.mxu1 %v4797_v0 }
 0x100   :  { %3925 = vmatpush1.bf16.msra.mxu0 %v4936_v41 }
 0x101   :  { %3927 = vmatprep.subr.bf16.mxu0 %v4942_v44  ;;  %3949 = vmatpush3.bf16.msra.mxu1 %v4949_v52 }
 0x102   :  { %3950 = vmatprep.subr.bf16.mxu1 %v4797_v0 }
 0x104   :  { %3929 = vmatpush1.bf16.msra.mxu0 %v4946_v50 }
 0x105   :  { %3931 = vmatprep.subr.bf16.mxu0 %v4952_v53  ;;  %3952 = vmatpush3.bf16.msra.mxu1 %v4959_v61 }
 0x106   :  { %3953 = vmatprep.subr.bf16.mxu1 %v4797_v0 }
 0x108   :  { %3933 = vmatpush1.bf16.msra.mxu0 %v4956_v59 }
 0x109   :  { %3935 = vmatprep.subr.bf16.mxu0 %v4962_v62  ;;  %3955 = vmatpush3.bf16.msra.mxu1 %v4969_v6 }
 0x10a   :  { %3956 = vmatprep.subr.bf16.mxu1 %v4797_v0 }
 0x10c   :  { %3937 = vmatpush1.bf16.msra.mxu0 %v4966_v4 }
 0x10d   :  { %3963 = vmatprep.subr.bf16.mxu0 %v4904_v5  ;;  %3958 = vmatpush3.bf16.msra.mxu1 %v4975_v12 }
 0x10e   :  { %3959 = vmatprep.subr.bf16.mxu1 %v4797_v0 }
 0x10f   :  { %1006 = vmatmul.mubr.f32.vlgmr.msra.gmra.mrb[10].mxu0 %v940_v24 }
 0x110   :  { %3965 = vmatpush1.bf16.msra.mxu0 %v4906_v9  ;;  %1152 = vmatprep.mubr.f32.mxu0 %v4798_v1 }
 0x111   :  { %3967 = vmatprep.subr.bf16.mxu0 %v4908_v10  ;;  %3961 = vmatpush3.bf16.msra.mxu1 %v4981_v17 }
 0x112   :  { %3994 = vmatprep.subr.bf16.mxu1 %v4797_v0 }
 0x114   :  { %3969 = vmatpush1.bf16.msra.mxu0 %v4912_v15  ;;  %3274 = vmatmul.mubr.f32.vlgmr.msra.gmra.mrb[10].mxu1 %v940_v24 }
 0x115   :  { %3971 = vmatprep.subr.bf16.mxu0 %v4915_v16  ;;  %3996 = vmatpush3.bf16.msra.mxu1 %v4923_v29 }
 0x116   :  { %3997 = vmatprep.subr.bf16.mxu1 %v4797_v0  ;;  %3308 = vmatprep.mubr.msk.f32.mxu1 %vm4799_vm0, %v4798_v1 }
 0x118   :  { %3973 = vmatpush1.bf16.msra.mxu0 %v4918_v21 }
 0x119   :  { %3975 = vmatprep.subr.bf16.mxu0 %v4921_v23  ;;  %3999 = vmatpush3.bf16.msra.mxu1 %v4929_v34 }
 0x11a   :  { %4000 = vmatprep.subr.bf16.mxu1 %v4797_v0 }
 0x11c   :  { %3977 = vmatpush1.bf16.msra.mxu0 %v4926_v32 }
 0x11d   :  { %3979 = vmatprep.subr.bf16.mxu0 %v4932_v35  ;;  %4002 = vmatpush3.bf16.msra.mxu1 %v4939_v43 }
 0x11e   :  { %4003 = vmatprep.subr.bf16.mxu1 %v4797_v0 }
 0x120   :  { %3981 = vmatpush1.bf16.msra.mxu0 %v4936_v41 }
 0x121   :  { %3983 = vmatprep.subr.bf16.mxu0 %v4942_v44  ;;  %4005 = vmatpush3.bf16.msra.mxu1 %v4949_v52 }
 0x122   :  { %4006 = vmatprep.subr.bf16.mxu1 %v4797_v0 }
 0x124   :  { %3985 = vmatpush1.bf16.msra.mxu0 %v4946_v50 }
 0x125   :  { %3987 = vmatprep.subr.bf16.mxu0 %v4952_v53  ;;  %4008 = vmatpush3.bf16.msra.mxu1 %v4959_v61 }
 0x126   :  { %4009 = vmatprep.subr.bf16.mxu1 %v4797_v0 }
 0x128   :  { %3989 = vmatpush1.bf16.msra.mxu0 %v4956_v59 }
 0x129   :  { %3991 = vmatprep.subr.bf16.mxu0 %v4962_v62  ;;  %4011 = vmatpush3.bf16.msra.mxu1 %v4969_v6 }
 0x12a   :  { %4012 = vmatprep.subr.bf16.mxu1 %v4797_v0 }
 0x12c   :  { %3993 = vmatpush1.bf16.msra.mxu0 %v4966_v4 }
 0x12d   :  { %4019 = vmatprep.subr.bf16.mxu0 %v4904_v5  ;;  %4014 = vmatpush3.bf16.msra.mxu1 %v4975_v12  ;;  %v135_v5 = vld [vmem:[#allocation10 + $0x8] sm:$0xff] }
 0x12e   :  { %4015 = vmatprep.subr.bf16.mxu1 %v4797_v0 }
 0x12f   :  { %1153 = vmatmul.mubr.f32.vlgmr.msra.gmra.mrb[12].mxu0 %v1087_v25 }
 0x130   :  { %4021 = vmatpush1.bf16.msra.mxu0 %v4906_v9  ;;  %1299 = vmatprep.mubr.f32.mxu0 %v4798_v1  ;;  %v138_v9 = vld [vmem:[#allocation10 + $0x20] sm:$0xff] }
 0x131   :  { %4023 = vmatprep.subr.bf16.mxu0 %v4908_v10  ;;  %4017 = vmatpush3.bf16.msra.mxu1 %v4981_v17  ;;  %v5221_v10 = vpack.c.bf16 %v138_v9, %v135_v5  ;;  %v5289_v5 = vpack.c.bf16 %v163_v19, %v160_v18  ;;  %v5292_v9 = vpack.c.bf16 %v180_v22, %v177_v20 }
 0x132   :  { %4050 = vmatprep.subr.bf16.mxu1 %v4797_v0 }
 0x134   :  { %4025 = vmatpush1.bf16.msra.mxu0 %v4912_v15  ;;  %3309 = vmatmul.mubr.f32.vlgmr.msra.gmra.mrb[12].mxu1 %v1087_v25  ;;  %v134_v15 = vld [vmem:[#allocation10] sm:$0xff]  ;;  %v176_v25 = vld [vmem:[#allocation10 + $0x150] sm:$0xff] }
 0x135   :  { %4027 = vmatprep.subr.bf16.mxu0 %v4915_v16  ;;  %4052 = vmatpush3.bf16.msra.mxu1 %v4923_v29  ;;  %v137_v16 = vld [vmem:[#allocation10 + $0x18] sm:$0xff] }
 0x136   :  { %4053 = vmatprep.subr.bf16.mxu1 %v4797_v0  ;;  %3343 = vmatprep.mubr.msk.f32.mxu1 %vm4799_vm0, %v4798_v1  ;;  %v5227_v29 = vpack.c.bf16 %v137_v16, %v134_v15  ;;  %v179_v15 = vld [vmem:[#allocation10 + $0x168] sm:$0xff]  ;;  %v166_v16 = vld [vmem:[#allocation10 + $0x100] sm:$0xff] }
 0x138   :  { %4029 = vmatpush1.bf16.msra.mxu0 %v4918_v21  ;;  %v141_v21 = vld [vmem:[#allocation10 + $0x38] sm:$0xff] }
 0x139   :  { %4031 = vmatprep.subr.bf16.mxu0 %v4921_v23  ;;  %4055 = vmatpush3.bf16.msra.mxu1 %v4929_v34  ;;  %v144_v23 = vld [vmem:[#allocation10 + $0x50] sm:$0xff]  ;;  %v150_v34 = vld [vmem:[#allocation10 + $0x80] sm:$0xff] }
 0x13a   :  { %4056 = vmatprep.subr.bf16.mxu1 %v4797_v0  ;;  %v5231_v30 = vpack.c.bf16 %v144_v23, %v141_v21  ;;  %v5239_v37 = vpack.c.bf16 %v150_v34, %v147_v33  ;;  %v169_v21 = vld [vmem:[#allocation10 + $0x118] sm:$0xff]  ;;  %v5296_v23 = vpack.c.bf16 %v179_v15, %v176_v25 }
 0x13b   :  { %v5306_v34 = vld [vmem:[#allocation7] sm:$0xff] }
 0x13c   :  { %4033 = vmatpush1.bf16.msra.mxu0 %v4926_v32  ;;  %v143_v32 = vld [vmem:[#allocation10 + $0x48] sm:$0xff] }
 0x13d   :  { %4035 = vmatprep.subr.bf16.mxu0 %v4932_v35  ;;  %4058 = vmatpush3.bf16.msra.mxu1 %v4939_v43  ;;  %v5235_v35 = vpack.c.bf16 %v143_v32, %v140_v31  ;;  %v5244_v43 = vpack.c.bf16 %v149_v38, %v146_v36  ;;  %v175_v31 = vld [vmem:[#allocation10 + $0x148] sm:$0xff]  ;;  %v178_v38 = vld [vmem:[#allocation10 + $0x160] sm:$0xff] }
 0x13e   :  { %4059 = vmatprep.subr.bf16.mxu1 %v4797_v0  ;;  %v5315_v40 = vpack.c.bf16 %v181_v39, %v178_v38 }
 0x140   :  { %4037 = vmatpush1.bf16.msra.mxu0 %v4936_v41  ;;  %v153_v41 = vld [vmem:[#allocation10 + $0x98] sm:$0xff] }
 0x141   :  { %4039 = vmatprep.subr.bf16.mxu0 %v4942_v44  ;;  %4061 = vmatpush3.bf16.msra.mxu1 %v4949_v52  ;;  %v152_v44 = vld [vmem:[#allocation10 + $0x90] sm:$0xff]  ;;  %v5250_v46 = vpack.c.bf16 %v156_v42, %v153_v41 }
 0x142   :  { %4062 = vmatprep.subr.bf16.mxu1 %v4797_v0  ;;  %v5254_v52 = vpack.c.bf16 %v155_v47, %v152_v44 }
 0x144   :  { %4041 = vmatpush1.bf16.msra.mxu0 %v4946_v50  ;;  %v159_v50 = vld [vmem:[#allocation10 + $0xc8] sm:$0xff] }
 0x145   :  { %4043 = vmatprep.subr.bf16.mxu0 %v4952_v53  ;;  %4064 = vmatpush3.bf16.msra.mxu1 %v4959_v61  ;;  %v158_v53 = vld [vmem:[#allocation10 + $0xc0] sm:$0xff]  ;;  %v5260_v55 = vpack.c.bf16 %v162_v51, %v159_v50 }
 0x146   :  { %4065 = vmatprep.subr.bf16.mxu1 %v4797_v0  ;;  %v5266_v61 = vpack.c.bf16 %v161_v56, %v158_v53 }
 0x147   :  { %v5224_v26 = vpop.f32.mrb[0].mxu1 }
 0x148   :  { %4045 = vmatpush1.bf16.msra.mxu0 %v4956_v59  ;;  %v3100_v27 = vpop.f32.mrb[1].mxu1  ;;  %v165_v59 = vld [vmem:[#allocation10 + $0xf8] sm:$0xff] }
 0x149   :  { %4047 = vmatprep.subr.bf16.mxu0 %v4962_v62  ;;  %4067 = vmatpush3.bf16.msra.mxu1 %v4969_v6  ;;  %v164_v62 = vld [vmem:[#allocation10 + $0xf0] sm:$0xff]  ;;  %v5272_v2 = vpack.c.bf16 %v168_v60, %v165_v59  ;;  %v157_v6 = vld [vmem:[#allocation10 + $0xb8] sm:$0xff]  ;;  %v5299_v27 = vpack.c.bf16 %v169_v21, %v166_v16  ;;  %v184_v59 = vlaneseq }
 0x14a   :  { %4068 = vmatprep.subr.bf16.mxu1 %v4797_v0  ;;  %v5276_v11 = vpack.c.bf16 %v167_v3, %v164_v62  ;;  %v182_v3 = vld [vmem:[%s5692_s4] sm:$0x7] }
 0x14b   :  { %v185_v60 = vshrl.u32 %v184_v59, 7 }
 0x14c   :  { %4049 = vmatpush1.bf16.msra.mxu0 %v4966_v4  ;;  %v154_v4 = vld [vmem:[#allocation10 + $0xa0] sm:$0xff] }
 0x14d   :  { %4075 = vmatprep.subr.bf16.mxu0 %v5221_v10  ;;  %4070 = vmatpush3.bf16.msra.mxu1 %v4975_v12  ;;  %v170_v12 = vld [vmem:[#allocation10 + $0x120] sm:$0xff]  ;;  %v5279_v13 = vpack.c.bf16 %v157_v6, %v154_v4  ;;  %v186_v62 = vsub.s32 0, %v185_v60  ;;  %v190_v4 = vsub.s32 1, %v185_v60  ;;  %v194_v21 = vsub.s32 2, %v185_v60 }
 0x14e   :  { %4071 = vmatprep.subr.bf16.mxu1 %v4797_v0 }
 0x14f   :  { %1300 = vmatmul.mubr.f32.vlgmr.msra.gmra.mrb[14].mxu0 %v1234_v28  ;;  %v5371_v6 = vrot.slane %v182_v3, %v186_v62  ;;  %v5373_v8 = vrot.slane %v182_v3, %v190_v4 }
 0x150   :  { %4077 = vmatpush1.bf16.msra.mxu0 %v5227_v29  ;;  %1448 = vmatprep.mubr.f32.mxu0 %v4798_v1 }
 0x151   :  { %4079 = vmatprep.subr.bf16.mxu0 %v5231_v30  ;;  %4073 = vmatpush3.bf16.msra.mxu1 %v4981_v17  ;;  %v173_v17 = vld [vmem:[#allocation10 + $0x138] sm:$0xff] }
 0x152   :  { %4106 = vmatprep.subr.bf16.mxu1 %v4797_v0  ;;  %v5286_v24 = vpack.c.bf16 %v173_v17, %v170_v12 }
 0x154   :  { %4081 = vmatpush1.bf16.msra.mxu0 %v5235_v35  ;;  %3344 = vmatmul.mubr.f32.vlgmr.msra.gmra.mrb[14].mxu1 %v1234_v28  ;;  %v172_v28 = vld [vmem:[#allocation10 + $0x130] sm:$0xff] }
 0x155   :  { %4083 = vmatprep.subr.bf16.mxu0 %v5239_v37  ;;  %4108 = vmatpush3.bf16.msra.mxu1 %v5247_v45  ;;  %v5309_v36 = vpack.c.bf16 %v175_v31, %v172_v28  ;;  %v5380_v31 = vld [vmem:[%s5693_s5] ss:$0 sm:$0xff]  ;;  %s4800_s5 = smov [#allocation12]  }
 0x156   :  { %4109 = vmatprep.subr.bf16.mxu1 %v4797_v0  ;;  %3378 = vmatprep.mubr.msk.f32.mxu1 %vm4799_vm0, %v4798_v1  ;;  %s2749_s8 = sshll.u32 %s4800_s5, 4  ;;  %s2750_s8 = int_to_ptr.vmem [resolvable:$true] %s2749_s8 }
 0x157   :  { %s4735_s11 = scalar_lea.vmem %s2750_s8, 1024  ;;  %p4740_p5 = scmp.lt.s32.totalorder %s2750_s8, %s2750_s8 }
 0x158   :  { %4085 = vmatpush1.bf16.msra.mxu0 %v5244_v43  ;;  %p4736_p4 = scmp.ne.s32.totalorder %s2750_s8, %s4735_s11  ;;  %p4741_p6 = scmp.lt.s32.totalorder %s4735_s11, %s4735_s11 }
 0x159   :  { %4087 = vmatprep.subr.bf16.mxu0 %v5250_v46  ;;  %4111 = vmatpush3.bf16.msra.mxu1 %v5257_v54 }
 0x15a   :  { %4112 = vmatprep.subr.bf16.mxu1 %v4797_v0  ;;  %p4742_p7 = por %p4741_p6, %p4740_p5 }
 0x15c   :  { %4089 = vmatpush1.bf16.msra.mxu0 %v5254_v52  ;;  %p4743_p8 = pnand %p4742_p7, %p4736_p4 }
 0x15d   :  { %4091 = vmatprep.subr.bf16.mxu0 %v5260_v55  ;;  %4114 = vmatpush3.bf16.msra.mxu1 %v5269_v63 }
 0x15e   :  { %4115 = vmatprep.subr.bf16.mxu1 %v4797_v0 }
 0x160   :  { %4093 = vmatpush1.bf16.msra.mxu0 %v5266_v61 }
 0x161   :  { %4095 = vmatprep.subr.bf16.mxu0 %v5272_v2  ;;  %4117 = vmatpush3.bf16.msra.mxu1 %v5279_v13 }
 0x162   :  { %4118 = vmatprep.subr.bf16.mxu1 %v4797_v0 }
 0x164   :  { %4097 = vmatpush1.bf16.msra.mxu0 %v5276_v11 }
 0x165   :  { %4099 = vmatprep.subr.bf16.mxu0 %v5282_v14  ;;  %4120 = vmatpush3.bf16.msra.mxu1 %v5289_v5 }
 0x166   :  { %4121 = vmatprep.subr.bf16.mxu1 %v4797_v0 }
 0x167   :  { %v5303_v32 = vpop.f32.mrb[2].mxu1 }
 0x168   :  { %4101 = vmatpush1.bf16.msra.mxu0 %v5286_v24  ;;  %v3135_v33 = vpop.f32.mrb[3].mxu1 }
 0x169   :  { %4103 = vmatprep.subr.bf16.mxu0 %v5292_v9  ;;  %4123 = vmatpush3.bf16.msra.mxu1 %v5299_v27  ;;  %v5382_v33 = vrot.slane %v182_v3, %v194_v21 }
 0x16a   :  { %4124 = vmatprep.subr.bf16.mxu1 %v4797_v0 }
 0x16c   :  { %4105 = vmatpush1.bf16.msra.mxu0 %v5296_v23 }
 0x16d   :  { %4131 = vmatprep.subr.bf16.mxu0 %v5221_v10  ;;  %4126 = vmatpush3.bf16.msra.mxu1 %v5309_v36 }
 0x16e   :  { %4127 = vmatprep.subr.bf16.mxu1 %v4797_v0 }
 0x16f   :  { %1449 = vmatmul.mubr.f32.vlgmr.msra.gmra.mrb[0].mxu0 %v5306_v34 }
 0x170   :  { %4133 = vmatpush1.bf16.msra.mxu0 %v5227_v29  ;;  %1617 = vmatprep.mubr.f32.mxu0 %v4798_v1 }
 0x171   :  { %4135 = vmatprep.subr.bf16.mxu0 %v5231_v30  ;;  %4129 = vmatpush3.bf16.msra.mxu1 %v5315_v40 }
 0x172   :  { %4162 = vmatprep.subr.bf16.mxu1 %v4797_v0 }
 0x174   :  { %4137 = vmatpush1.bf16.msra.mxu0 %v5235_v35  ;;  %3379 = vmatmul.mubr.f32.vlgmr.msra.gmra.mrb[16].mxu1 %v5306_v34 }
 0x175   :  { %4139 = vmatprep.subr.bf16.mxu0 %v5239_v37  ;;  %4164 = vmatpush3.bf16.msra.mxu1 %v5247_v45 }
 0x176   :  { %4165 = vmatprep.subr.bf16.mxu1 %v4797_v0  ;;  %3413 = vmatprep.mubr.msk.f32.mxu1 %vm4799_vm0, %v4798_v1 }
 0x178   :  { %4141 = vmatpush1.bf16.msra.mxu0 %v5244_v43 }
 0x179   :  { %4143 = vmatprep.subr.bf16.mxu0 %v5250_v46  ;;  %4167 = vmatpush3.bf16.msra.mxu1 %v5257_v54 }
 0x17a   :  { %4168 = vmatprep.subr.bf16.mxu1 %v4797_v0 }
 0x17c   :  { %4145 = vmatpush1.bf16.msra.mxu0 %v5254_v52 }
 0x17d   :  { %4147 = vmatprep.subr.bf16.mxu0 %v5260_v55  ;;  %4170 = vmatpush3.bf16.msra.mxu1 %v5269_v63 }
 0x17e   :  { %4171 = vmatprep.subr.bf16.mxu1 %v4797_v0 }
 0x180   :  { %4149 = vmatpush1.bf16.msra.mxu0 %v5266_v61 }
 0x181   :  { %4151 = vmatprep.subr.bf16.mxu0 %v5272_v2  ;;  %4173 = vmatpush3.bf16.msra.mxu1 %v5279_v13 }
 0x182   :  { %4174 = vmatprep.subr.bf16.mxu1 %v4797_v0 }
 0x184   :  { %4153 = vmatpush1.bf16.msra.mxu0 %v5276_v11 }
 0x185   :  { %4155 = vmatprep.subr.bf16.mxu0 %v5282_v14  ;;  %4176 = vmatpush3.bf16.msra.mxu1 %v5289_v5 }
 0x186   :  { %4177 = vmatprep.subr.bf16.mxu1 %v4797_v0 }
 0x187   :  { %v5348_v41 = vpop.f32.mrb[4].mxu1 }
 0x188   :  { %4157 = vmatpush1.bf16.msra.mxu0 %v5286_v24  ;;  %v3170_v42 = vpop.f32.mrb[5].mxu1 }
 0x189   :  { %4159 = vmatprep.subr.bf16.mxu0 %v5292_v9  ;;  %4179 = vmatpush3.bf16.msra.mxu1 %v5299_v27 }
 0x18a   :  { %4180 = vmatprep.subr.bf16.mxu1 %v4797_v0 }
 0x18c   :  { %4161 = vmatpush1.bf16.msra.mxu0 %v5296_v23 }
 0x18d   :  { %4187 = vmatprep.subr.bf16.mxu0 %v5221_v10  ;;  %4182 = vmatpush3.bf16.msra.mxu1 %v5309_v36 }
 0x18e   :  { %4183 = vmatprep.subr.bf16.mxu1 %v4797_v0 }
 0x191   :  { %4185 = vmatpush3.bf16.msra.mxu1 %v5315_v40 }
 0x192   :  { %4218 = vmatprep.subr.bf16.mxu1 %v4797_v0 }
 0x1a7   :  { %v5358_v44 = vpop.f32.mrb[6].mxu1 }
 0x1a8   :  { %v3205_v47 = vpop.f32.mrb[7].mxu1 }
 0x1a9   :  { %v345_v47 = vadd.f32 %v5224_v26, %v5382_v33 }
 0x1c7   :  { %v5360_v48 = vpop.f32.mrb[8].mxu1 }
 0x1c8   :  { %v3240_v49 = vpop.f32.mrb[9].mxu1 }
 0x1e7   :  { %v5362_v50 = vpop.f32.mrb[10].mxu1 }
 0x1e8   :  { %v3275_v51 = vpop.f32.mrb[11].mxu1 }
 0x207   :  { %v5364_v53 = vpop.f32.mrb[12].mxu1 }
 0x208   :  { %v3310_v56 = vpop.f32.mrb[13].mxu1 }
 0x227   :  { %v5366_v57 = vpop.f32.mrb[14].mxu1 }
 0x228   :  { %v3345_v58 = vpop.f32.mrb[15].mxu1 }
 0x242   :  { %v1450_v7 = vpop.f32.mrb[0].mxu0 }
 0x243   :  { %v4522_v12 = vadd.f32 %v1450_v7, %v5371_v6  ;;  %v1452_v17 = vpop.f32.mrb[1].mxu0 }
 0x244   :  { %v4523_v19 = vadd.f32 %v1452_v17, %v5373_v8 }
 0x245   :  { %v2778_v18 = vmul.f32 -1.442695, %v4522_v12 }
 0x246   :  { %v2779_v20 = vmul.f32 -1.442695, %v4523_v19 }
 0x247   :  { %4567 = vpow2.f32 %v2778_v18  ;;  %v1521_v22 = vpop.f32.mrb[16].mxu1 }
 0x248   :  { %v3380_v25 = vpop.f32.mrb[17].mxu1  ;;  %4569 = vpow2.f32 %v2779_v20  ;;  %v1539_v39 = vadd.f32 %v5380_v31, %v1521_v22 }
 0x251   :  { %v4568_v15 = vpop.eup %4567 }
 0x252   :  { %v1529_v16 = vadd.f32 1.0, %v4568_v15  ;;  %v4570_v28 = vpop.eup %4569 }
 0x253   :  { %v1536_v38 = vadd.f32 1.0, %v4570_v28  ;;  %v491_v28 = vadd.f32 %v5303_v32, %v5382_v33 }
 0x254   :  { %4571 = vrcp.f32 %v1529_v16 }
 0x255   :  { %4573 = vrcp.f32 %v1536_v38 }
 0x25e   :  { %v4572_v42 = vpop.eup %4571 }
 0x25f   :  { %v1540_v49 = vmul.f32 %v4572_v42, %v1539_v39  ;;  %v4574_v56 = vpop.eup %4573 }
 0x260   :  { %v1543_v58 = vsub.f32 1.0, %v4574_v56  ;;  %v1545_v62 = vmul.f32 %v4574_v56, %v5306_v34 }
 0x261   :  { %v1541_v51 = vadd.f32 %v1540_v49, %v345_v47 }
 0x263   :  { %4575 = vtanh.f32 %v1541_v51 }
 0x26d   :  { %v4576_v59 = vpop.eup %4575 }
 0x26e   :  { %v1544_v60 = vmul.f32 %v4576_v59, %v1543_v58 }
 0x270   :  { %v5388_v4 = vadd.f32 %v1545_v62, %v1544_v60 }
 0x272   :  { %1548 = vst [vmem:[#allocation12] sm:$0xff] %v5388_v4  ;;  %1618 = vmatmul.mubr.f32.vlgmr.msra.gmra.mrb[2].mxu0 %v5388_v4  ;;  %3414 = vmatmul.mubr.f32.vlgmr.msra.gmra.mrb[18].mxu1 %v5388_v4 }
 0x273   :  { %4189 = vmatpush1.bf16.msra.mxu0 %v5227_v29  ;;  %4220 = vmatpush3.bf16.msra.mxu1 %v5247_v45 }
 0x274   :  { %4191 = vmatprep.subr.bf16.mxu0 %v5231_v30  ;;  %4221 = vmatprep.subr.bf16.mxu1 %v4797_v0 }
 0x275   :  { %1787 = vmatprep.mubr.f32.mxu0 %v4798_v1  ;;  %3448 = vmatprep.mubr.msk.f32.mxu1 %vm4799_vm0, %v4798_v1 }
 0x277   :  { %4193 = vmatpush1.bf16.msra.mxu0 %v5235_v35  ;;  %4223 = vmatpush3.bf16.msra.mxu1 %v5257_v54 }
 0x278   :  { %4195 = vmatprep.subr.bf16.mxu0 %v5239_v37  ;;  %4224 = vmatprep.subr.bf16.mxu1 %v4797_v0 }
 0x27b   :  { %4197 = vmatpush1.bf16.msra.mxu0 %v5244_v43  ;;  %4226 = vmatpush3.bf16.msra.mxu1 %v5269_v63 }
 0x27c   :  { %4199 = vmatprep.subr.bf16.mxu0 %v5250_v46  ;;  %4227 = vmatprep.subr.bf16.mxu1 %v4797_v0 }
 0x27f   :  { %4201 = vmatpush1.bf16.msra.mxu0 %v5254_v52  ;;  %4229 = vmatpush3.bf16.msra.mxu1 %v5279_v13 }
 0x280   :  { %4203 = vmatprep.subr.bf16.mxu0 %v5260_v55  ;;  %4230 = vmatprep.subr.bf16.mxu1 %v4797_v0 }
 0x283   :  { %4205 = vmatpush1.bf16.msra.mxu0 %v5266_v61  ;;  %4232 = vmatpush3.bf16.msra.mxu1 %v5289_v5 }
 0x284   :  { %4207 = vmatprep.subr.bf16.mxu0 %v5272_v2  ;;  %4233 = vmatprep.subr.bf16.mxu1 %v4797_v0 }
 0x287   :  { %4209 = vmatpush1.bf16.msra.mxu0 %v5276_v11  ;;  %4235 = vmatpush3.bf16.msra.mxu1 %v5299_v27 }
 0x288   :  { %4211 = vmatprep.subr.bf16.mxu0 %v5282_v14  ;;  %4236 = vmatprep.subr.bf16.mxu1 %v4797_v0 }
 0x28b   :  { %4213 = vmatpush1.bf16.msra.mxu0 %v5286_v24  ;;  %4238 = vmatpush3.bf16.msra.mxu1 %v5309_v36 }
 0x28c   :  { %4215 = vmatprep.subr.bf16.mxu0 %v5292_v9  ;;  %4239 = vmatprep.subr.bf16.mxu1 %v4797_v0 }
 0x28f   :  { %4217 = vmatpush1.bf16.msra.mxu0 %v5296_v23  ;;  %4241 = vmatpush3.bf16.msra.mxu1 %v5315_v40 }
 0x290   :  { %4243 = vmatprep.subr.bf16.mxu0 %v5221_v10  ;;  %4274 = vmatprep.subr.bf16.mxu1 %v4797_v0 }
 0x345   :  { %v1619_v26 = vpop.f32.mrb[2].mxu0  ;;  %v1690_v34 = vpop.f32.mrb[18].mxu1 }
 0x346   :  { %v4524_v3 = vadd.f32 %v1619_v26, %v5371_v6  ;;  %v1621_v7 = vpop.f32.mrb[3].mxu0  ;;  %v3415_v12 = vpop.f32.mrb[19].mxu1  ;;  %v1708_v16 = vadd.f32 %v5380_v31, %v1690_v34 }
 0x347   :  { %v4525_v18 = vadd.f32 %v1621_v7, %v5373_v8 }
 0x348   :  { %v2780_v17 = vmul.f32 -1.442695, %v4524_v3 }
 0x349   :  { %v2781_v19 = vmul.f32 -1.442695, %v4525_v18 }
 0x34a   :  { %4577 = vpow2.f32 %v2780_v17 }
 0x34b   :  { %4579 = vpow2.f32 %v2781_v19 }
 0x354   :  { %v4578_v20 = vpop.eup %4577 }
 0x355   :  { %v1698_v22 = vadd.f32 1.0, %v4578_v20  ;;  %v4580_v25 = vpop.eup %4579 }
 0x356   :  { %v1705_v15 = vadd.f32 1.0, %v4580_v25 }
 0x357   :  { %4581 = vrcp.f32 %v1698_v22  ;;  %v638_v22 = vadd.f32 %v5348_v41, %v5382_v33 }
 0x358   :  { %4583 = vrcp.f32 %v1705_v15 }
 0x361   :  { %v4582_v21 = vpop.eup %4581 }
 0x362   :  { %v1709_v38 = vmul.f32 %v4582_v21, %v1708_v16  ;;  %v4584_v42 = vpop.eup %4583 }
 0x363   :  { %v1712_v47 = vsub.f32 1.0, %v4584_v42  ;;  %v1714_v56 = vmul.f32 %v4584_v42, %v5388_v4 }
 0x364   :  { %v1710_v39 = vadd.f32 %v1709_v38, %v491_v28 }
 0x366   :  { %4585 = vtanh.f32 %v1710_v39 }
 0x370   :  { %v4586_v49 = vpop.eup %4585 }
 0x371   :  { %v1713_v51 = vmul.f32 %v4586_v49, %v1712_v47 }
 0x373   :  { %v5434_v58 = vadd.f32 %v1714_v56, %v1713_v51 }
 0x375   :  { %1718 = vst [vmem:[#allocation12 + $0x8] sm:$0xff] %v5434_v58  ;;  %1788 = vmatmul.mubr.f32.vlgmr.msra.gmra.mrb[4].mxu0 %v5434_v58  ;;  %3449 = vmatmul.mubr.f32.vlgmr.msra.gmra.mrb[20].mxu1 %v5434_v58 }
 0x376   :  { %4245 = vmatpush1.bf16.msra.mxu0 %v5227_v29  ;;  %4276 = vmatpush3.bf16.msra.mxu1 %v5247_v45 }
 0x377   :  { %4247 = vmatprep.subr.bf16.mxu0 %v5231_v30  ;;  %4277 = vmatprep.subr.bf16.mxu1 %v4797_v0 }
 0x378   :  { %1957 = vmatprep.mubr.f32.mxu0 %v4798_v1  ;;  %3483 = vmatprep.mubr.msk.f32.mxu1 %vm4799_vm0, %v4798_v1 }
 0x37a   :  { %4249 = vmatpush1.bf16.msra.mxu0 %v5235_v35  ;;  %4279 = vmatpush3.bf16.msra.mxu1 %v5257_v54 }
 0x37b   :  { %4251 = vmatprep.subr.bf16.mxu0 %v5239_v37  ;;  %4280 = vmatprep.subr.bf16.mxu1 %v4797_v0 }
 0x37e   :  { %4253 = vmatpush1.bf16.msra.mxu0 %v5244_v43  ;;  %4282 = vmatpush3.bf16.msra.mxu1 %v5269_v63 }
 0x37f   :  { %4255 = vmatprep.subr.bf16.mxu0 %v5250_v46  ;;  %4283 = vmatprep.subr.bf16.mxu1 %v4797_v0 }
 0x382   :  { %4257 = vmatpush1.bf16.msra.mxu0 %v5254_v52  ;;  %4285 = vmatpush3.bf16.msra.mxu1 %v5279_v13 }
 0x383   :  { %4259 = vmatprep.subr.bf16.mxu0 %v5260_v55  ;;  %4286 = vmatprep.subr.bf16.mxu1 %v4797_v0 }
 0x386   :  { %4261 = vmatpush1.bf16.msra.mxu0 %v5266_v61  ;;  %4288 = vmatpush3.bf16.msra.mxu1 %v5289_v5 }
 0x387   :  { %4263 = vmatprep.subr.bf16.mxu0 %v5272_v2  ;;  %4289 = vmatprep.subr.bf16.mxu1 %v4797_v0 }
 0x38a   :  { %4265 = vmatpush1.bf16.msra.mxu0 %v5276_v11  ;;  %4291 = vmatpush3.bf16.msra.mxu1 %v5299_v27 }
 0x38b   :  { %4267 = vmatprep.subr.bf16.mxu0 %v5282_v14  ;;  %4292 = vmatprep.subr.bf16.mxu1 %v4797_v0 }
 0x38e   :  { %4269 = vmatpush1.bf16.msra.mxu0 %v5286_v24  ;;  %4294 = vmatpush3.bf16.msra.mxu1 %v5309_v36 }
 0x38f   :  { %4271 = vmatprep.subr.bf16.mxu0 %v5292_v9  ;;  %4295 = vmatprep.subr.bf16.mxu1 %v4797_v0 }
 0x392   :  { %4273 = vmatpush1.bf16.msra.mxu0 %v5296_v23  ;;  %4297 = vmatpush3.bf16.msra.mxu1 %v5315_v40 }
 0x393   :  { %4299 = vmatprep.subr.bf16.mxu0 %v5221_v10  ;;  %4330 = vmatprep.subr.bf16.mxu1 %v4797_v0 }
 0x448   :  { %v1789_v32 = vpop.f32.mrb[4].mxu0  ;;  %v1860_v59 = vpop.f32.mrb[20].mxu1 }
 0x449   :  { %v4526_v60 = vadd.f32 %v1789_v32, %v5371_v6  ;;  %v1791_v62 = vpop.f32.mrb[5].mxu0  ;;  %v3450_v4 = vpop.f32.mrb[21].mxu1  ;;  %v1878_v19 = vadd.f32 %v5380_v31, %v1860_v59 }
 0x44a   :  { %v4527_v34 = vadd.f32 %v1791_v62, %v5373_v8 }
 0x44b   :  { %v2782_v26 = vmul.f32 -1.442695, %v4526_v60 }
 0x44c   :  { %v2783_v3 = vmul.f32 -1.442695, %v4527_v34 }
 0x44d   :  { %4587 = vpow2.f32 %v2782_v26 }
 0x44e   :  { %4589 = vpow2.f32 %v2783_v3 }
 0x457   :  { %v4588_v7 = vpop.eup %4587 }
 0x458   :  { %v1868_v12 = vadd.f32 1.0, %v4588_v7  ;;  %v4590_v17 = vpop.eup %4589  ;;  %v785_v7 = vadd.f32 %v5358_v44, %v5382_v33 }
 0x459   :  { %v1875_v18 = vadd.f32 1.0, %v4590_v17 }
 0x45a   :  { %4591 = vrcp.f32 %v1868_v12 }
 0x45b   :  { %4593 = vrcp.f32 %v1875_v18 }
 0x464   :  { %v4592_v20 = vpop.eup %4591 }
 0x465   :  { %v1879_v25 = vmul.f32 %v4592_v20, %v1878_v19  ;;  %v4594_v16 = vpop.eup %4593 }
 0x466   :  { %v1882_v21 = vsub.f32 1.0, %v4594_v16  ;;  %v1884_v39 = vmul.f32 %v4594_v16, %v5434_v58 }
 0x467   :  { %v1880_v15 = vadd.f32 %v1879_v25, %v638_v22 }
 0x469   :  { %4595 = vtanh.f32 %v1880_v15 }
 0x473   :  { %v4596_v28 = vpop.eup %4595 }
 0x474   :  { %v1883_v38 = vmul.f32 %v4596_v28, %v1882_v21 }
 0x476   :  { %v5480_v42 = vadd.f32 %v1884_v39, %v1883_v38 }
 0x478   :  { %1888 = vst [vmem:[#allocation12 + $0x10] sm:$0xff] %v5480_v42  ;;  %1958 = vmatmul.mubr.f32.vlgmr.msra.gmra.mrb[6].mxu0 %v5480_v42  ;;  %3484 = vmatmul.mubr.f32.vlgmr.msra.gmra.mrb[22].mxu1 %v5480_v42 }
 0x479   :  { %4301 = vmatpush1.bf16.msra.mxu0 %v5227_v29  ;;  %4332 = vmatpush3.bf16.msra.mxu1 %v5247_v45 }
 0x47a   :  { %4303 = vmatprep.subr.bf16.mxu0 %v5231_v30  ;;  %4333 = vmatprep.subr.bf16.mxu1 %v4797_v0 }
 0x47b   :  { %2127 = vmatprep.mubr.f32.mxu0 %v4798_v1  ;;  %3518 = vmatprep.mubr.msk.f32.mxu1 %vm4799_vm0, %v4798_v1 }
 0x47d   :  { %4305 = vmatpush1.bf16.msra.mxu0 %v5235_v35  ;;  %4335 = vmatpush3.bf16.msra.mxu1 %v5257_v54 }
 0x47e   :  { %4307 = vmatprep.subr.bf16.mxu0 %v5239_v37  ;;  %4336 = vmatprep.subr.bf16.mxu1 %v4797_v0 }
 0x481   :  { %4309 = vmatpush1.bf16.msra.mxu0 %v5244_v43  ;;  %4338 = vmatpush3.bf16.msra.mxu1 %v5269_v63 }
 0x482   :  { %4311 = vmatprep.subr.bf16.mxu0 %v5250_v46  ;;  %4339 = vmatprep.subr.bf16.mxu1 %v4797_v0 }
 0x485   :  { %4313 = vmatpush1.bf16.msra.mxu0 %v5254_v52  ;;  %4341 = vmatpush3.bf16.msra.mxu1 %v5279_v13 }
 0x486   :  { %4315 = vmatprep.subr.bf16.mxu0 %v5260_v55  ;;  %4342 = vmatprep.subr.bf16.mxu1 %v4797_v0 }
 0x489   :  { %4317 = vmatpush1.bf16.msra.mxu0 %v5266_v61  ;;  %4344 = vmatpush3.bf16.msra.mxu1 %v5289_v5 }
 0x48a   :  { %4319 = vmatprep.subr.bf16.mxu0 %v5272_v2  ;;  %4345 = vmatprep.subr.bf16.mxu1 %v4797_v0 }
 0x48d   :  { %4321 = vmatpush1.bf16.msra.mxu0 %v5276_v11  ;;  %4347 = vmatpush3.bf16.msra.mxu1 %v5299_v27 }
 0x48e   :  { %4323 = vmatprep.subr.bf16.mxu0 %v5282_v14  ;;  %4348 = vmatprep.subr.bf16.mxu1 %v4797_v0 }
 0x491   :  { %4325 = vmatpush1.bf16.msra.mxu0 %v5286_v24  ;;  %4350 = vmatpush3.bf16.msra.mxu1 %v5309_v36 }
 0x492   :  { %4327 = vmatprep.subr.bf16.mxu0 %v5292_v9  ;;  %4351 = vmatprep.subr.bf16.mxu1 %v4797_v0 }
 0x495   :  { %4329 = vmatpush1.bf16.msra.mxu0 %v5296_v23  ;;  %4353 = vmatpush3.bf16.msra.mxu1 %v5315_v40 }
 0x496   :  { %4355 = vmatprep.subr.bf16.mxu0 %v5221_v10  ;;  %4386 = vmatprep.subr.bf16.mxu1 %v4797_v0 }
 0x54b   :  { %v1959_v41 = vpop.f32.mrb[6].mxu0  ;;  %v2030_v47 = vpop.f32.mrb[22].mxu1 }
 0x54c   :  { %v4528_v49 = vadd.f32 %v1959_v41, %v5371_v6  ;;  %v1961_v51 = vpop.f32.mrb[7].mxu0  ;;  %v3485_v56 = vpop.f32.mrb[23].mxu1  ;;  %v2048_v34 = vadd.f32 %v5380_v31, %v2030_v47 }
 0x54d   :  { %v4529_v32 = vadd.f32 %v1961_v51, %v5373_v8 }
 0x54e   :  { %v2784_v58 = vmul.f32 -1.442695, %v4528_v49 }
 0x54f   :  { %v2785_v59 = vmul.f32 -1.442695, %v4529_v32 }
 0x550   :  { %4597 = vpow2.f32 %v2784_v58 }
 0x551   :  { %4599 = vpow2.f32 %v2785_v59  ;;  %v932_v59 = vadd.f32 %v5360_v48, %v5382_v33 }
 0x55a   :  { %v4598_v60 = vpop.eup %4597 }
 0x55b   :  { %v2038_v62 = vadd.f32 1.0, %v4598_v60  ;;  %v4600_v4 = vpop.eup %4599 }
 0x55c   :  { %v2045_v26 = vadd.f32 1.0, %v4600_v4 }
 0x55d   :  { %4601 = vrcp.f32 %v2038_v62 }
 0x55e   :  { %4603 = vrcp.f32 %v2045_v26 }
 0x567   :  { %v4602_v3 = vpop.eup %4601 }
 0x568   :  { %v2049_v12 = vmul.f32 %v4602_v3, %v2048_v34  ;;  %v4604_v18 = vpop.eup %4603 }
 0x569   :  { %v2052_v19 = vsub.f32 1.0, %v4604_v18  ;;  %v2054_v25 = vmul.f32 %v4604_v18, %v5480_v42 }
 0x56a   :  { %v2050_v17 = vadd.f32 %v2049_v12, %v785_v7 }
 0x56c   :  { %4605 = vtanh.f32 %v2050_v17 }
 0x576   :  { %v4606_v20 = vpop.eup %4605 }
 0x577   :  { %v2053_v22 = vmul.f32 %v4606_v20, %v2052_v19 }
 0x579   :  { %v5526_v15 = vadd.f32 %v2054_v25, %v2053_v22 }
 0x57b   :  { %2058 = vst [vmem:[#allocation12 + $0x18] sm:$0xff] %v5526_v15  ;;  %2128 = vmatmul.mubr.f32.vlgmr.msra.gmra.mrb[8].mxu0 %v5526_v15  ;;  %3519 = vmatmul.mubr.f32.vlgmr.msra.gmra.mrb[24].mxu1 %v5526_v15 }
 0x57c   :  { %4357 = vmatpush1.bf16.msra.mxu0 %v5227_v29  ;;  %4388 = vmatpush3.bf16.msra.mxu1 %v5247_v45 }
 0x57d   :  { %4359 = vmatprep.subr.bf16.mxu0 %v5231_v30  ;;  %4389 = vmatprep.subr.bf16.mxu1 %v4797_v0 }
 0x57e   :  { %2297 = vmatprep.mubr.f32.mxu0 %v4798_v1  ;;  %3553 = vmatprep.mubr.msk.f32.mxu1 %vm4799_vm0, %v4798_v1 }
 0x580   :  { %4361 = vmatpush1.bf16.msra.mxu0 %v5235_v35  ;;  %4391 = vmatpush3.bf16.msra.mxu1 %v5257_v54 }
 0x581   :  { %4363 = vmatprep.subr.bf16.mxu0 %v5239_v37  ;;  %4392 = vmatprep.subr.bf16.mxu1 %v4797_v0 }
 0x584   :  { %4365 = vmatpush1.bf16.msra.mxu0 %v5244_v43  ;;  %4394 = vmatpush3.bf16.msra.mxu1 %v5269_v63 }
 0x585   :  { %4367 = vmatprep.subr.bf16.mxu0 %v5250_v46  ;;  %4395 = vmatprep.subr.bf16.mxu1 %v4797_v0 }
 0x588   :  { %4369 = vmatpush1.bf16.msra.mxu0 %v5254_v52  ;;  %4397 = vmatpush3.bf16.msra.mxu1 %v5279_v13 }
 0x589   :  { %4371 = vmatprep.subr.bf16.mxu0 %v5260_v55  ;;  %4398 = vmatprep.subr.bf16.mxu1 %v4797_v0 }
 0x58c   :  { %4373 = vmatpush1.bf16.msra.mxu0 %v5266_v61  ;;  %4400 = vmatpush3.bf16.msra.mxu1 %v5289_v5 }
 0x58d   :  { %4375 = vmatprep.subr.bf16.mxu0 %v5272_v2  ;;  %4401 = vmatprep.subr.bf16.mxu1 %v4797_v0 }
 0x590   :  { %4377 = vmatpush1.bf16.msra.mxu0 %v5276_v11  ;;  %4403 = vmatpush3.bf16.msra.mxu1 %v5299_v27 }
 0x591   :  { %4379 = vmatprep.subr.bf16.mxu0 %v5282_v14  ;;  %4404 = vmatprep.subr.bf16.mxu1 %v4797_v0 }
 0x594   :  { %4381 = vmatpush1.bf16.msra.mxu0 %v5286_v24  ;;  %4406 = vmatpush3.bf16.msra.mxu1 %v5309_v36 }
 0x595   :  { %4383 = vmatprep.subr.bf16.mxu0 %v5292_v9  ;;  %4407 = vmatprep.subr.bf16.mxu1 %v4797_v0 }
 0x598   :  { %4385 = vmatpush1.bf16.msra.mxu0 %v5296_v23  ;;  %4409 = vmatpush3.bf16.msra.mxu1 %v5315_v40 }
 0x599   :  { %4411 = vmatprep.subr.bf16.mxu0 %v5221_v10  ;;  %4442 = vmatprep.subr.bf16.mxu1 %v4797_v0 }
 0x64e   :  { %v2129_v44 = vpop.f32.mrb[8].mxu0  ;;  %v2200_v16 = vpop.f32.mrb[24].mxu1 }
 0x64f   :  { %v4530_v21 = vadd.f32 %v2129_v44, %v5371_v6  ;;  %v2131_v28 = vpop.f32.mrb[9].mxu0  ;;  %v3520_v38 = vpop.f32.mrb[25].mxu1  ;;  %v2218_v58 = vadd.f32 %v5380_v31, %v2200_v16 }
 0x650   :  { %v4531_v42 = vadd.f32 %v2131_v28, %v5373_v8 }
 0x651   :  { %v2786_v39 = vmul.f32 -1.442695, %v4530_v21 }
 0x652   :  { %v2787_v41 = vmul.f32 -1.442695, %v4531_v42 }
 0x653   :  { %4607 = vpow2.f32 %v2786_v39  ;;  %v1079_v39 = vadd.f32 %v5362_v50, %v5382_v33 }
 0x654   :  { %4609 = vpow2.f32 %v2787_v41 }
 0x65d   :  { %v4608_v47 = vpop.eup %4607 }
 0x65e   :  { %v2208_v49 = vadd.f32 1.0, %v4608_v47  ;;  %v4610_v51 = vpop.eup %4609 }
 0x65f   :  { %v2215_v56 = vadd.f32 1.0, %v4610_v51 }
 0x660   :  { %4611 = vrcp.f32 %v2208_v49 }
 0x661   :  { %4613 = vrcp.f32 %v2215_v56 }
 0x66a   :  { %v4612_v32 = vpop.eup %4611 }
 0x66b   :  { %v2219_v60 = vmul.f32 %v4612_v32, %v2218_v58  ;;  %v4614_v4 = vpop.eup %4613 }
 0x66c   :  { %v2222_v26 = vsub.f32 1.0, %v4614_v4  ;;  %v2224_v7 = vmul.f32 %v4614_v4, %v5526_v15 }
 0x66d   :  { %v2220_v62 = vadd.f32 %v2219_v60, %v932_v59 }
 0x66f   :  { %4615 = vtanh.f32 %v2220_v62 }
 0x679   :  { %v4616_v34 = vpop.eup %4615 }
 0x67a   :  { %v2223_v3 = vmul.f32 %v4616_v34, %v2222_v26 }
 0x67c   :  { %v5572_v12 = vadd.f32 %v2224_v7, %v2223_v3 }
 0x67e   :  { %2228 = vst [vmem:[#allocation12 + $0x20] sm:$0xff] %v5572_v12  ;;  %2298 = vmatmul.mubr.f32.vlgmr.msra.gmra.mrb[10].mxu0 %v5572_v12  ;;  %3554 = vmatmul.mubr.f32.vlgmr.msra.gmra.mrb[26].mxu1 %v5572_v12 }
 0x67f   :  { %4413 = vmatpush1.bf16.msra.mxu0 %v5227_v29  ;;  %4444 = vmatpush3.bf16.msra.mxu1 %v5247_v45 }
 0x680   :  { %4415 = vmatprep.subr.bf16.mxu0 %v5231_v30  ;;  %4445 = vmatprep.subr.bf16.mxu1 %v4797_v0 }
 0x681   :  { %2467 = vmatprep.mubr.f32.mxu0 %v4798_v1  ;;  %3588 = vmatprep.mubr.msk.f32.mxu1 %vm4799_vm0, %v4798_v1 }
 0x683   :  { %4417 = vmatpush1.bf16.msra.mxu0 %v5235_v35  ;;  %4447 = vmatpush3.bf16.msra.mxu1 %v5257_v54 }
 0x684   :  { %4419 = vmatprep.subr.bf16.mxu0 %v5239_v37  ;;  %4448 = vmatprep.subr.bf16.mxu1 %v4797_v0 }
 0x687   :  { %4421 = vmatpush1.bf16.msra.mxu0 %v5244_v43  ;;  %4450 = vmatpush3.bf16.msra.mxu1 %v5269_v63 }
 0x688   :  { %4423 = vmatprep.subr.bf16.mxu0 %v5250_v46  ;;  %4451 = vmatprep.subr.bf16.mxu1 %v4797_v0 }
 0x68b   :  { %4425 = vmatpush1.bf16.msra.mxu0 %v5254_v52  ;;  %4453 = vmatpush3.bf16.msra.mxu1 %v5279_v13 }
 0x68c   :  { %4427 = vmatprep.subr.bf16.mxu0 %v5260_v55  ;;  %4454 = vmatprep.subr.bf16.mxu1 %v4797_v0 }
 0x68f   :  { %4429 = vmatpush1.bf16.msra.mxu0 %v5266_v61  ;;  %4456 = vmatpush3.bf16.msra.mxu1 %v5289_v5 }
 0x690   :  { %4431 = vmatprep.subr.bf16.mxu0 %v5272_v2  ;;  %4457 = vmatprep.subr.bf16.mxu1 %v4797_v0 }
 0x693   :  { %4433 = vmatpush1.bf16.msra.mxu0 %v5276_v11  ;;  %4459 = vmatpush3.bf16.msra.mxu1 %v5299_v27 }
 0x694   :  { %4435 = vmatprep.subr.bf16.mxu0 %v5282_v14  ;;  %4460 = vmatprep.subr.bf16.mxu1 %v4797_v0 }
 0x697   :  { %4437 = vmatpush1.bf16.msra.mxu0 %v5286_v24  ;;  %4462 = vmatpush3.bf16.msra.mxu1 %v5309_v36 }
 0x698   :  { %4439 = vmatprep.subr.bf16.mxu0 %v5292_v9  ;;  %4463 = vmatprep.subr.bf16.mxu1 %v4797_v0 }
 0x69b   :  { %4441 = vmatpush1.bf16.msra.mxu0 %v5296_v23  ;;  %4465 = vmatpush3.bf16.msra.mxu1 %v5315_v40 }
 0x69c   :  { %4467 = vmatprep.subr.bf16.mxu0 %v5221_v10  ;;  %4498 = vmatprep.subr.bf16.mxu1 %v4797_v0 }
 0x751   :  { %v2299_v48 = vpop.f32.mrb[10].mxu0  ;;  %v2370_v17 = vpop.f32.mrb[26].mxu1 }
 0x752   :  { %v4532_v18 = vadd.f32 %v2299_v48, %v5371_v6  ;;  %v2301_v19 = vpop.f32.mrb[11].mxu0  ;;  %v3555_v20 = vpop.f32.mrb[27].mxu1  ;;  %v2388_v10 = vadd.f32 %v5380_v31, %v2370_v17  ;;  %v1373_v17 = vadd.f32 %v5366_v57, %v5382_v33 }
 0x753   :  { %v4533_v25 = vadd.f32 %v2301_v19, %v5373_v8 }
 0x754   :  { %v2788_v22 = vmul.f32 -1.442695, %v4532_v18 }
 0x755   :  { %v2789_v15 = vmul.f32 -1.442695, %v4533_v25 }
 0x756   :  { %4617 = vpow2.f32 %v2788_v22 }
 0x757   :  { %4619 = vpow2.f32 %v2789_v15 }
 0x760   :  { %v4618_v44 = vpop.eup %4617 }
 0x761   :  { %v2378_v16 = vadd.f32 1.0, %v4618_v44  ;;  %v4620_v21 = vpop.eup %4619 }
 0x762   :  { %v2385_v28 = vadd.f32 1.0, %v4620_v21 }
 0x763   :  { %4621 = vrcp.f32 %v2378_v16 }
 0x764   :  { %4623 = vrcp.f32 %v2385_v28 }
 0x76d   :  { %v4622_v38 = vpop.eup %4621 }
 0x76e   :  { %v2389_v42 = vmul.f32 %v4622_v38, %v2388_v10  ;;  %v4624_v47 = vpop.eup %4623 }
 0x76f   :  { %v2392_v49 = vsub.f32 1.0, %v4624_v47  ;;  %v2394_v58 = vmul.f32 %v4624_v47, %v5572_v12 }
 0x770   :  { %v2390_v41 = vadd.f32 %v2389_v42, %v1079_v39 }
 0x772   :  { %4625 = vtanh.f32 %v2390_v41 }
 0x77c   :  { %v4626_v51 = vpop.eup %4625 }
 0x77d   :  { %v2393_v56 = vmul.f32 %v4626_v51, %v2392_v49 }
 0x77f   :  { %v2395_v32 = vadd.f32 %v2394_v58, %v2393_v56 }
 0x781   :  { %2398 = vst [vmem:[#allocation12 + $0x28] sm:$0xff] %v2395_v32  ;;  %2468 = vmatmul.mubr.f32.vlgmr.msra.gmra.mrb[12].mxu0 %v2395_v32  ;;  %3589 = vmatmul.mubr.f32.vlgmr.msra.gmra.mrb[28].mxu1 %v2395_v32 }
 0x782   :  { %4469 = vmatpush1.bf16.msra.mxu0 %v5227_v29  ;;  %4500 = vmatpush3.bf16.msra.mxu1 %v5247_v45 }
 0x783   :  { %4471 = vmatprep.subr.bf16.mxu0 %v5231_v30  ;;  %4501 = vmatprep.subr.bf16.mxu1 %v4797_v0 }
 0x784   :  { %2637 = vmatprep.mubr.f32.mxu0 %v4798_v1  ;;  %3623 = vmatprep.mubr.msk.f32.mxu1 %vm4799_vm0, %v4798_v1 }
 0x786   :  { %4473 = vmatpush1.bf16.msra.mxu0 %v5235_v35  ;;  %4503 = vmatpush3.bf16.msra.mxu1 %v5257_v54 }
 0x787   :  { %4475 = vmatprep.subr.bf16.mxu0 %v5239_v37  ;;  %4504 = vmatprep.subr.bf16.mxu1 %v4797_v0 }
 0x78a   :  { %4477 = vmatpush1.bf16.msra.mxu0 %v5244_v43  ;;  %4506 = vmatpush3.bf16.msra.mxu1 %v5269_v63 }
 0x78b   :  { %4479 = vmatprep.subr.bf16.mxu0 %v5250_v46  ;;  %4507 = vmatprep.subr.bf16.mxu1 %v4797_v0 }
 0x78e   :  { %4481 = vmatpush1.bf16.msra.mxu0 %v5254_v52  ;;  %4509 = vmatpush3.bf16.msra.mxu1 %v5279_v13 }
 0x78f   :  { %4483 = vmatprep.subr.bf16.mxu0 %v5260_v55  ;;  %4510 = vmatprep.subr.bf16.mxu1 %v4797_v0 }
 0x792   :  { %4485 = vmatpush1.bf16.msra.mxu0 %v5266_v61  ;;  %4512 = vmatpush3.bf16.msra.mxu1 %v5289_v5 }
 0x793   :  { %4487 = vmatprep.subr.bf16.mxu0 %v5272_v2  ;;  %4513 = vmatprep.subr.bf16.mxu1 %v4797_v0  ;;  %v1226_v2 = vadd.f32 %v5364_v53, %v5382_v33 }
 0x796   :  { %4489 = vmatpush1.bf16.msra.mxu0 %v5276_v11  ;;  %4515 = vmatpush3.bf16.msra.mxu1 %v5299_v27 }
 0x797   :  { %4491 = vmatprep.subr.bf16.mxu0 %v5282_v14  ;;  %4516 = vmatprep.subr.bf16.mxu1 %v4797_v0 }
 0x79a   :  { %4493 = vmatpush1.bf16.msra.mxu0 %v5286_v24  ;;  %4518 = vmatpush3.bf16.msra.mxu1 %v5309_v36 }
 0x79b   :  { %4495 = vmatprep.subr.bf16.mxu0 %v5292_v9  ;;  %4519 = vmatprep.subr.bf16.mxu1 %v4797_v0 }
 0x79e   :  { %4497 = vmatpush1.bf16.msra.mxu0 %v5296_v23  ;;  %4521 = vmatpush3.bf16.msra.mxu1 %v5315_v40 }
 0x854   :  { %v2469_v1 = vpop.f32.mrb[12].mxu0  ;;  %v2540_v29 = vpop.f32.mrb[28].mxu1 }
 0x855   :  { %v4534_v30 = vadd.f32 %v2469_v1, %v5371_v6  ;;  %v2471_v35 = vpop.f32.mrb[13].mxu0  ;;  %v3590_v37 = vpop.f32.mrb[29].mxu1  ;;  %v2558_v61 = vadd.f32 %v5380_v31, %v2540_v29 }
 0x856   :  { %v4535_v45 = vadd.f32 %v2471_v35, %v5373_v8 }
 0x857   :  { %v2790_v43 = vmul.f32 -1.442695, %v4534_v30 }
 0x858   :  { %v2791_v46 = vmul.f32 -1.442695, %v4535_v45 }
 0x859   :  { %4627 = vpow2.f32 %v2790_v43 }
 0x85a   :  { %4629 = vpow2.f32 %v2791_v46 }
 0x863   :  { %v4628_v52 = vpop.eup %4627 }
 0x864   :  { %v2548_v54 = vadd.f32 1.0, %v4628_v52  ;;  %v4630_v0 = vpop.eup %4629 }
 0x865   :  { %v2555_v55 = vadd.f32 1.0, %v4630_v0 }
 0x866   :  { %4631 = vrcp.f32 %v2548_v54 }
 0x867   :  { %4633 = vrcp.f32 %v2555_v55 }
 0x870   :  { %v4632_v63 = vpop.eup %4631 }
 0x871   :  { %v2559_v11 = vmul.f32 %v4632_v63, %v2558_v61  ;;  %v4634_v14 = vpop.eup %4633 }
 0x872   :  { %v2562_v24 = vsub.f32 1.0, %v4634_v14  ;;  %v2564_v23 = vmul.f32 %v4634_v14, %v2395_v32 }
 0x873   :  { %v2560_v13 = vadd.f32 %v2559_v11, %v1226_v2 }
 0x875   :  { %4635 = vtanh.f32 %v2560_v13 }
 0x87f   :  { %v4636_v5 = vpop.eup %4635 }
 0x880   :  { %v2563_v9 = vmul.f32 %v4636_v5, %v2562_v24 }
 0x882   :  { %v2565_v27 = vadd.f32 %v2564_v23, %v2563_v9 }
 0x884   :  { %2568 = vst [vmem:[#allocation12 + $0x30] sm:$0xff] %v2565_v27  ;;  %2638 = vmatmul.mubr.f32.vlgmr.msra.gmra.mrb[14].mxu0 %v2565_v27  ;;  %3624 = vmatmul.mubr.f32.vlgmr.msra.gmra.mrb[30].mxu1 %v2565_v27 }
 0x957   :  { %v2639_v36 = vpop.f32.mrb[14].mxu0  ;;  %v2710_v40 = vpop.f32.mrb[30].mxu1 }
 0x958   :  { %v4536_v50 = vadd.f32 %v2639_v36, %v5371_v6  ;;  %v2641_v59 = vpop.f32.mrb[15].mxu0  ;;  %v3625_v60 = vpop.f32.mrb[31].mxu1  ;;  %v2728_v12 = vadd.f32 %v5380_v31, %v2710_v40 }
 0x959   :  { %v4537_v62 = vadd.f32 %v2641_v59, %v5373_v8 }
 0x95a   :  { %v2792_v53 = vmul.f32 -1.442695, %v4536_v50 }
 0x95b   :  { %v2793_v4 = vmul.f32 -1.442695, %v4537_v62 }
 0x95c   :  { %4637 = vpow2.f32 %v2792_v53 }
 0x95d   :  { %4639 = vpow2.f32 %v2793_v4 }
 0x966   :  { %v4638_v26 = vpop.eup %4637 }
 0x967   :  { %v2718_v34 = vadd.f32 1.0, %v4638_v26  ;;  %v4640_v3 = vpop.eup %4639 }
 0x968   :  { %v2725_v7 = vadd.f32 1.0, %v4640_v3 }
 0x969   :  { %4641 = vrcp.f32 %v2718_v34 }
 0x96a   :  { %4643 = vrcp.f32 %v2725_v7 }
 0x973   :  { %v4642_v48 = vpop.eup %4641 }
 0x974   :  { %v2729_v6 = vmul.f32 %v4642_v48, %v2728_v12  ;;  %v4644_v19 = vpop.eup %4643 }
 0x975   :  { %v2732_v8 = vsub.f32 1.0, %v4644_v19  ;;  %v2734_v25 = vmul.f32 %v4644_v19, %v2565_v27 }
 0x976   :  { %v2730_v18 = vadd.f32 %v2729_v6, %v1373_v17 }
 0x978   :  { %4645 = vtanh.f32 %v2730_v18 }
 0x982   :  { %v4646_v20 = vpop.eup %4645 }
 0x983   :  { %v2733_v22 = vmul.f32 %v4646_v20, %v2732_v8 }
 0x985   :  { %v2735_v15 = vadd.f32 %v2734_v25, %v2733_v22 }
 0x987   :  { %2738 = vst [vmem:[#allocation12 + $0x38] sm:$0xff] %v2735_v15  ;;  %2743 = vst [vmem:[#allocation13] sm:$0xff] %v2735_v15 }
 0x988   :  { %4746 = shalt.err (!%p4743_p8)
}
 0x989   :  { %s4747_s0 = scalar_lea.hbm %s5694_s6, 1024 }
 0x98a   :  { %p4748_p9 = scmp.ne.s32.totalorder %s5694_s6, %s4747_s0  ;;  %p4751_p10 = scmp.lt.u32.totalorder %s4747_s0, %s5694_s6 }
 0x98c   :  { %p4753_p11 = pnand %p4751_p10, %p4748_p9 }
 0x98e   :  { %4756 = shalt.err (!%p4753_p11)
}
 0x98f   :  { %2755 = dma.vmem_to_hbm [thread:$0]  %s2750_s8, 1024, %s5694_s6, [#allocation6], %s4791_s1, %s4791_s1, %s4792_s23  }
 0x990   :  { %s4757_s19 = scalar_lea.vmem %s2763_s10, 128  ;;  %p4762_p13 = scmp.lt.s32.totalorder %s2763_s10, %s2763_s10 }
 0x991   :  { %p4758_p12 = scmp.ne.s32.totalorder %s2763_s10, %s4757_s19  ;;  %p4763_p0 = scmp.lt.s32.totalorder %s4757_s19, %s4757_s19 }
 0x993   :  { %p4764_p1 = por %p4763_p0, %p4762_p13 }
 0x995   :  { %p4765_p2 = pnand %p4764_p1, %p4758_p12 }
 0x997   :  { %4768 = shalt.err (!%p4765_p2)
}
 0x998   :  { %s4769_s22 = scalar_lea.hbm %s5695_s7, 128 }
 0x999   :  { %p4770_p3 = scmp.ne.s32.totalorder %s5695_s7, %s4769_s22  ;;  %p4773_p4 = scmp.lt.u32.totalorder %s4769_s22, %s5695_s7 }
 0x99b   :  { %p4775_p5 = pnand %p4773_p4, %p4770_p3 }
 0x99d   :  { %4778 = shalt.err (!%p4775_p5)
}
 0x99e   :  { %2765 = dma.vmem_to_hbm [thread:$0]  %s2763_s10, 128, %s5695_s7, [#allocation14]  }
 0x99f   :  { %4785 = dma.done.wait [#allocation6], 1024  }
 0x9a0   :  { %4786 = vsyncadd [#allocation6], 4294966272 }
 0x9a1   :  { %4787 = dma.done.wait [#allocation14], 128  }
 0x9a2   :  { %4788 = vsyncadd [#allocation14], 4294967168 }
 0x9a3   :  { %2772 = vsyncpa [#allocation5], 1 }
 0x9a4   :  { %2773 = vsyncpa [#allocation8], 1 }
 0x9a5   :  { %2774 = vsyncpa [#allocation11], 1 }
 0x9a6   :  { %2775 = vsyncpa [#allocation6], 1 }
 0x9a7   :  { %2776 = vsyncpa [#allocation14], 1 }

</bundles_post_ra>
